<compile_context>
chip_gen: v7x
topology: tpu7x:2x2x1
jax: 0.10.0
libtpu: 0.0.40
codegen_flags: <defaults>
</compile_context>

<pallas_src>
import functools
import math

import jax
import jax.numpy as jnp
from jax.experimental import pallas as pl
from jax.experimental.pallas import tpu as pltpu


PROJ_ROW_TILE = 256   # seq-tile for projection / output-projection kernels
ATTN_ROW_TILE = 128   # q-tile for attention (VMEM-friendlier on v7x's 64 MiB)


def _row_tile(n, max_tile):
    # Full dim when small (always layout-legal), otherwise a fixed row tile.
    return n if n <= max_tile else max_tile


def _vmem_limit_bytes(per_step_bytes):
    # Double-buffered per-step estimate plus slack, clamped to a budget that is
    # valid on every generation (v7x: 64 MiB physical per TensorCore; v5e's
    # *default* scoped limit is only 16 MiB, so we always raise it to >=32 MiB).
    need = 2 * int(per_step_bytes) + (4 << 20)
    return int(min(max(need, 32 << 20), 56 << 20))


# ----------------------------------------------------------------------------
# Kernel 1: fused Q/K/V projection, one (batch, seq-tile) step per grid point.
# Weights [d_model, H*Dk] have constant index_maps -> loaded once, resident.
# ----------------------------------------------------------------------------
def _qkv_proj_kernel(xq_ref, xk_ref, xv_ref,
                     wq_ref, wk_ref, wv_ref,
                     bq_ref, bk_ref, bv_ref,
                     q_ref, k_ref, v_ref):
    def proj(x_ref, w_ref, b_ref, o_ref):
        # [ts, d_model](bf16) @ [d_model, H*Dk](bf16) -> f32 on the MXU, + bias.
        y = jnp.dot(x_ref[0], w_ref[...], preferred_element_type=jnp.float32)
        o_ref[0] = (y + b_ref[...]).astype(o_ref.dtype)

    proj(xq_ref, wq_ref, bq_ref, q_ref)
    proj(xk_ref, wk_ref, bk_ref, k_ref)
    proj(xv_ref, wv_ref, bv_ref, v_ref)


def qkv_projection(xq, xk, xv, wq, wk, wv, bq, bk, bv, *, out_dtype):
    B, S, d_model = xq.shape
    HDk = wq.shape[-1]
    HDv = wv.shape[-1]
    ts = _row_tile(S, PROJ_ROW_TILE)
    grid = (B, pl.cdiv(S, ts))

    x_spec = pl.BlockSpec((1, ts, d_model), lambda b, si: (b, si, 0))

    def w_spec(n):   # resident weights (constant block index)
        return pl.BlockSpec((d_model, n), lambda b, si: (0, 0))

    def b_spec(n):
        return pl.BlockSpec((1, n), lambda b, si: (0, 0))

    def o_spec(n):
        return pl.BlockSpec((1, ts, n), lambda b, si: (b, si, 0))

    per_step = (3 * ts * d_model * 2                      # x tiles (bf16)
                + (2 * HDk + HDv) * d_model * 2           # resident weights (bf16)
                + (2 * HDk + HDv) * 4                     # biases (f32)
                + ts * (2 * HDk + HDv) * 2)               # outputs (bf16)

    return pl.pallas_call(
        _qkv_proj_kernel,
        grid=grid,
        in_specs=[x_spec, x_spec, x_spec,
                  w_spec(HDk), w_spec(HDk), w_spec(HDv),
                  b_spec(HDk), b_spec(HDk), b_spec(HDv)],
        out_specs=(o_spec(HDk), o_spec(HDk), o_spec(HDv)),
        out_shape=(jax.ShapeDtypeStruct((B, S, HDk), out_dtype),
                   jax.ShapeDtypeStruct((B, S, HDk), out_dtype),
                   jax.ShapeDtypeStruct((B, S, HDv), out_dtype)),
        compiler_params=pltpu.CompilerParams(
            dimension_semantics=("parallel", "parallel"),
            vmem_limit_bytes=_vmem_limit_bytes(per_step)),
    )(xq, xk, xv, wq, wk, wv, bq, bk, bv)


# ----------------------------------------------------------------------------
# Kernel 2: scaled-dot-product attention, one (batch, q-tile) step covering
# ALL heads: mask DMA'd once per q-tile, ctx stored head-concatenated
# (lane-dense [tq, H*Dv]), attn stored per head in bf16.
# ----------------------------------------------------------------------------
def _attention_kernel(q_ref, k_ref, v_ref, m_ref, ctx_ref, attn_ref,
                      *, n_heads, d_k, d_v):
    q_all = q_ref[0]                      # [tq, H*Dk] bf16 (already / sqrt(d_k))
    k_all = k_ref[0]                      # [S,  H*Dk] bf16
    v_all = v_ref[0]                      # [S,  H*Dv] bf16
    masked = m_ref[0] != 0                # int8 -> bool, no f32 convert

    ctx_parts = []
    for h in range(n_heads):              # static unroll; all heads share the mask
        q_h = q_all[:, h * d_k:(h + 1) * d_k]
        k_h = k_all[:, h * d_k:(h + 1) * d_k]
        v_h = v_all[:, h * d_v:(h + 1) * d_v]

        # scores = q @ k^T (contract over d_k), f32 accumulation on the MXU.
        s = jax.lax.dot_general(q_h, k_h, (((1,), (1,)), ((), ())),
                                preferred_element_type=jnp.float32)
        s = jnp.where(masked, jnp.float32(-1e9), s)        # masked_fill_ semantics

        # Numerically-stable softmax in f32 (exact reciprocal of the [tq,1]
        # denominator, so returned rows sum to ~1 within f32 rounding).
        s = s - jnp.max(s, axis=-1, keepdims=True)
        e = jnp.exp(s)
        p = e * pl.reciprocal(jnp.sum(e, axis=-1, keepdims=True))

        p_lo = p.astype(attn_ref.dtype)          # single bf16 cast, reused below
        attn_ref[0, h] = p_lo
        ctx_parts.append(jnp.dot(p_lo.astype(v_h.dtype), v_h,
                                 preferred_element_type=jnp.float32))

    # Head-concatenated context -> one lane-dense [tq, H*Dv] store.
    ctx_ref[0] = jnp.concatenate(ctx_parts, axis=-1).astype(ctx_ref.dtype)


def scaled_dot_product_attention(q, k, v, mask_i8, *, n_heads, d_k, d_v,
                                 attn_dtype=jnp.bfloat16):
    # q, k: [B, S, H*Dk]; v: [B, S, H*Dv]; mask_i8: [B, S, S] (nonzero == masked).
    # TODO(synk): KV-tiled online-softmax (flash) variant for very long S; the
    # module returns the full [B, H, S, S] attn, so full-S scores are kept here.
    B, S, HDk = q.shape
    HDv = v.shape[-1]
    tq = _row_tile(S, ATTN_ROW_TILE)
    grid = (B, pl.cdiv(S, tq))

    attn_isize = jnp.dtype(attn_dtype).itemsize
    per_step = ((tq * HDk + S * HDk + S * HDv + tq * HDv) * 2   # q/k/v/ctx (bf16)
                + tq * S                                         # int8 mask tile
                + n_heads * tq * S * attn_isize                  # attn out tile
                + 3 * tq * S * 4)                                # f32 scores working set

    kernel = functools.partial(_attention_kernel,
                               n_heads=n_heads, d_k=d_k, d_v=d_v)
    ctx, attn = pl.pallas_call(
        kernel,
        grid=grid,
        in_specs=[
            pl.BlockSpec((1, tq, HDk), lambda b, qi: (b, qi, 0)),
            pl.BlockSpec((1, S, HDk), lambda b, qi: (b, 0, 0)),   # K resident per batch
            pl.BlockSpec((1, S, HDv), lambda b, qi: (b, 0, 0)),   # V resident per batch
            pl.BlockSpec((1, tq, S), lambda b, qi: (b, qi, 0)),   # mask once per q-tile
        ],
        out_specs=(
            pl.BlockSpec((1, tq, HDv), lambda b, qi: (b, qi, 0)),
            pl.BlockSpec((1, n_heads, tq, S), lambda b, qi: (b, 0, qi, 0)),
        ),
        out_shape=(
            jax.ShapeDtypeStruct((B, S, HDv), q.dtype),           # bf16 context
            jax.ShapeDtypeStruct((B, n_heads, S, S), attn_dtype), # bf16 probabilities
        ),
        compiler_params=pltpu.CompilerParams(
            dimension_semantics=("parallel", "parallel"),
            vmem_limit_bytes=_vmem_limit_bytes(per_step)),
    )(q, k, v, mask_i8)
    return ctx, attn


# ----------------------------------------------------------------------------
# Kernel 3: output projection (single full-depth matmul) + bias + residual +
# LayerNorm, fused; one (batch, seq-tile) step per grid point.
# ----------------------------------------------------------------------------
def _out_ln_kernel(ctx_ref, w_ref, b_ref, res_ref, g_ref, beta_ref, o_ref, *, eps):
    # [ts, H*Dv](bf16) @ [H*Dv, d_model](bf16) -> f32 (K = H*Dv, full MXU depth).
    y = jnp.dot(ctx_ref[0], w_ref[...], preferred_element_type=jnp.float32)
    y = y + b_ref[...] + res_ref[0]
    mean = jnp.mean(y, axis=-1, keepdims=True)
    var = jnp.mean(jnp.square(y - mean), axis=-1, keepdims=True)
    y_hat = (y - mean) * jax.lax.rsqrt(var + eps)
    o_ref[0] = (y_hat * g_ref[...] + beta_ref[...]).astype(o_ref.dtype)


def out_proj_layernorm(ctx, w_o, b_o, residual, gamma, beta, *, eps=1e-5):
    B, S, HDv = ctx.shape
    d_model = w_o.shape[-1]
    ts = _row_tile(S, PROJ_ROW_TILE)
    grid = (B, pl.cdiv(S, ts))

    per_step = (ts * HDv * 2 + HDv * d_model * 2            # ctx + resident W_O (bf16)
                + 2 * ts * d_model * 4 + 3 * d_model * 4)    # residual/out + vectors (f32)

    kernel = functools.partial(_out_ln_kernel, eps=eps)
    return pl.pallas_call(
        kernel,
        grid=grid,
        in_specs=[
            pl.BlockSpec((1, ts, HDv), lambda b, si: (b, si, 0)),
            pl.BlockSpec((HDv, d_model), lambda b, si: (0, 0)),   # resident W_O
            pl.BlockSpec((1, d_model), lambda b, si: (0, 0)),
            pl.BlockSpec((1, ts, d_model), lambda b, si: (b, si, 0)),
            pl.BlockSpec((1, d_model), lambda b, si: (0, 0)),
            pl.BlockSpec((1, d_model), lambda b, si: (0, 0)),
        ],
        out_specs=pl.BlockSpec((1, ts, d_model), lambda b, si: (b, si, 0)),
        out_shape=jax.ShapeDtypeStruct((B, S, d_model), jnp.float32),
        compiler_params=pltpu.CompilerParams(
            dimension_semantics=("parallel", "parallel"),
            vmem_limit_bytes=_vmem_limit_bytes(per_step)),
    )(ctx, w_o, b_o, residual, gamma, beta)


# ----------------------------------------------------------------------------
# MultiHeadAttention forward (wrapper: only free reshapes/casts, no transposes)
# ----------------------------------------------------------------------------
def multi_head_attention(params, Q, K, V, attn_mask, n_heads, d_k,
                         *, mm_dtype=jnp.bfloat16, attn_dtype=jnp.bfloat16):
    # Q, K, V: [B, S, d_model] f32; attn_mask: [B, S_q, S_k] bool (True == masked).
    B, S, d_model = Q.shape
    d_v = d_k
    inv_scale = 1.0 / math.sqrt(float(d_k))

    # bf16 matmul operands (f32 accumulation in-kernel); 1/sqrt(d_k) folded into
    # W_Q / b_Q so no O(S^2) scale op runs inside the attention kernel.
    wq = (params["W_Q_w"] * inv_scale).astype(mm_dtype)
    bq = (params["W_Q_b"] * inv_scale).reshape(1, -1)
    wk = params["W_K_w"].astype(mm_dtype)
    bk = params["W_K_b"].reshape(1, -1)
    wv = params["W_V_w"].astype(mm_dtype)
    bv = params["W_V_b"].reshape(1, -1)
    wo = params["W_O_w"].astype(mm_dtype)

    q, k, v = qkv_projection(
        Q.astype(mm_dtype), K.astype(mm_dtype), V.astype(mm_dtype),
        wq, wk, wv, bq, bk, bv, out_dtype=mm_dtype)

    mask_i8 = attn_mask.astype(jnp.int8)          # 1 byte/key instead of 4
    ctx, attn = scaled_dot_product_attention(
        q, k, v, mask_i8, n_heads=n_heads, d_k=d_k, d_v=d_v,
        attn_dtype=attn_dtype)

    out = out_proj_layernorm(
        ctx, wo, params["W_O_b"].reshape(1, -1),
        Q,                                         # residual (f32)
        params["ln_gamma"].reshape(1, -1),
        params["ln_beta"].reshape(1, -1))
    return out, attn


def init_params(key, n_heads, d_model, d_k):
    d_v = d_k
    ks = jax.random.split(key, 8)

    def unif(k, shape, fan_in):
        bound = 1.0 / math.sqrt(float(fan_in))
        return jax.random.uniform(k, shape, jnp.float32, -bound, bound)

    # NOTE: weights stored pre-transposed as [d_in, d_out] (nn.Linear weight.T);
    # the PyTorch module creates W_O / LayerNorm fresh inside forward() — here
    # they are initialized once so the forward pass is deterministic.
    return {
        "W_Q_w": unif(ks[0], (d_model, n_heads * d_k), d_model),
        "W_Q_b": unif(ks[1], (n_heads * d_k,), d_model),
        "W_K_w": unif(ks[2], (d_model, n_heads * d_k), d_model),
        "W_K_b": unif(ks[3], (n_heads * d_k,), d_model),
        "W_V_w": unif(ks[4], (d_model, n_heads * d_v), d_model),
        "W_V_b": unif(ks[5], (n_heads * d_v,), d_model),
        "W_O_w": unif(ks[6], (n_heads * d_v, d_model), n_heads * d_v),
        "W_O_b": unif(ks[7], (d_model,), n_heads * d_v),
        "ln_gamma": jnp.ones((d_model,), jnp.float32),
        "ln_beta": jnp.zeros((d_model,), jnp.float32),
    }


# Pure-JAX f32 reference (same math as the PyTorch module) for a sanity check.
def multi_head_attention_reference(params, Q, K, V, attn_mask, n_heads, d_k):
    hp = jax.lax.Precision.HIGHEST
    B, S, d_model = Q.shape
    d_v = d_k
    scale = math.sqrt(float(d_k))

    def split(x):   # [B, S, H*D] -> [B, H, S, D]  (== .view(...).transpose(1, 2))
        return x.reshape(B, S, n_heads, -1).transpose(0, 2, 1, 3)

    q = split(jnp.dot(Q, params["W_Q_w"], precision=hp) + params["W_Q_b"])
    k = split(jnp.dot(K, params["W_K_w"], precision=hp) + params["W_K_b"])
    v = split(jnp.dot(V, params["W_V_w"], precision=hp) + params["W_V_b"])
    scores = jnp.einsum("bhqd,bhkd->bhqk", q, k, precision=hp) / scale
    scores = jnp.where(attn_mask[:, None, :, :], jnp.float32(-1e9), scores)
    attn = jax.nn.softmax(scores, axis=-1)
    ctx = jnp.einsum("bhqk,bhkd->bhqd", attn, v, precision=hp)
    ctx = ctx.transpose(0, 2, 1, 3).reshape(B, S, n_heads * d_v)
    y = jnp.dot(ctx, params["W_O_w"], precision=hp) + params["W_O_b"] + Q
    mean = jnp.mean(y, axis=-1, keepdims=True)
    var = jnp.mean(jnp.square(y - mean), axis=-1, keepdims=True)
    out = (y - mean) * jax.lax.rsqrt(var + 1e-5) * params["ln_gamma"] + params["ln_beta"]
    return out, attn


if __name__ == "__main__":
    B, S, d_model, n_heads, d_k = 2, 8, 32, 4, 8

    key = jax.random.PRNGKey(0)
    kq, kk, kv, kp = jax.random.split(key, 4)
    Q = jax.random.normal(kq, (B, S, d_model), jnp.float32)
    K = jax.random.normal(kk, (B, S, d_model), jnp.float32)
    V = jax.random.normal(kv, (B, S, d_model), jnp.float32)

    # Padding-style mask: mask out keys beyond a per-batch valid length.
    valid_len = jnp.array([6, 4], dtype=jnp.int32)
    key_ids = jnp.arange(S)[None, None, :]                  # [1, 1, S]
    attn_mask = jnp.broadcast_to(key_ids >= valid_len[:, None, None], (B, S, S))

    params = init_params(kp, n_heads, d_model, d_k)

    mha = jax.jit(functools.partial(multi_head_attention,
                                    n_heads=n_heads, d_k=d_k))
    out, attn = mha(params, Q, K, V, attn_mask)
    jax.block_until_ready((out, attn))

    assert out.shape == (B, S, d_model) and out.dtype == jnp.float32
    assert attn.shape == (B, n_heads, S, S)
    assert bool(jnp.all(jnp.isfinite(out))) and bool(jnp.all(jnp.isfinite(attn)))

    out_ref, attn_ref = multi_head_attention_reference(
        params, Q, K, V, attn_mask, n_heads, d_k)
    # Loose tolerances: kernels use bf16 matmul operands (f32 accumulation) and
    # return bf16 attention probabilities.
    assert float(jnp.max(jnp.abs(out - out_ref))) < 0.25
    assert float(jnp.max(jnp.abs(attn.astype(jnp.float32) - attn_ref))) < 0.08

    print("KERNEL_OK")
</pallas_src>

<mosaic_0001>
module attributes {stable_mosaic.version = 11 : i64} {
  func.func @_out_ln_kernel(%arg0: i32, %arg1: i32, %arg2: memref<1x8x32xbf16, #tpu.memory_space<vmem>>, %arg3: memref<32x32xbf16, #tpu.memory_space<vmem>>, %arg4: memref<1x32xf32, #tpu.memory_space<vmem>>, %arg5: memref<1x8x32xf32, #tpu.memory_space<vmem>>, %arg6: memref<1x32xf32, #tpu.memory_space<vmem>>, %arg7: memref<1x32xf32, #tpu.memory_space<vmem>>, %arg8: memref<1x8x32xf32, #tpu.memory_space<vmem>>) attributes {dimension_semantics = [#tpu.dimension_semantics<parallel>, #tpu.dimension_semantics<parallel>], iteration_bounds = array<i64: 2, 1>, scalar_prefetch = 0 : i64, scratch_operands = 0 : i64, tpu.core_type = #tpu.core_type<tc>, window_params = [{transform_indices = @transform_0, window_bounds = array<i64: 1, 8, 32>}, {pipeline_mode = #tpu.pipeline_mode<synchronous>, transform_indices = @transform_1, window_bounds = array<i64: 32, 32>}, {pipeline_mode = #tpu.pipeline_mode<synchronous>, transform_indices = @transform_2, window_bounds = array<i64: 1, 32>}, {transform_indices = @transform_3, window_bounds = array<i64: 1, 8, 32>}, {pipeline_mode = #tpu.pipeline_mode<synchronous>, transform_indices = @transform_4, window_bounds = array<i64: 1, 32>}, {pipeline_mode = #tpu.pipeline_mode<synchronous>, transform_indices = @transform_5, window_bounds = array<i64: 1, 32>}, {transform_indices = @transform_6, window_bounds = array<i64: 1, 8, 32>}]} {
    %c0 = arith.constant 0 : index
    %c0_0 = arith.constant 0 : index
    %c0_1 = arith.constant 0 : index
    %0 = vector.load %arg2[%c0, %c0_0, %c0_1] : memref<1x8x32xbf16, #tpu.memory_space<vmem>>, vector<1x8x32xbf16>
    %1 = vector.shape_cast %0 : vector<1x8x32xbf16> to vector<8x32xbf16>
    %c0_2 = arith.constant 0 : index
    %c0_3 = arith.constant 0 : index
    %2 = vector.load %arg3[%c0_2, %c0_3] : memref<32x32xbf16, #tpu.memory_space<vmem>>, vector<32x32xbf16>
    %cst = arith.constant dense<0.000000e+00> : vector<8x32xf32>
    %3 = tpu.matmul %1, %2, %cst {dimension_numbers = #tpu.dot_dimension_numbers<[1], [0], [0], [1], [0, 0, 1, 1], [], []>} : vector<8x32xbf16>, vector<32x32xbf16>, vector<8x32xf32> -> vector<8x32xf32>
    %c0_4 = arith.constant 0 : index
    %c0_5 = arith.constant 0 : index
    %4 = vector.load %arg4[%c0_4, %c0_5] : memref<1x32xf32, #tpu.memory_space<vmem>>, vector<1x32xf32>
    %5 = vector.broadcast %4 : vector<1x32xf32> to vector<8x32xf32>
    %6 = arith.addf %3, %5 : vector<8x32xf32>
    %c0_6 = arith.constant 0 : index
    %c0_7 = arith.constant 0 : index
    %c0_8 = arith.constant 0 : index
    %7 = vector.load %arg5[%c0_6, %c0_7, %c0_8] : memref<1x8x32xf32, #tpu.memory_space<vmem>>, vector<1x8x32xf32>
    %8 = vector.shape_cast %7 : vector<1x8x32xf32> to vector<8x32xf32>
    %9 = arith.addf %6, %8 : vector<8x32xf32>
    %cst_9 = arith.constant dense<0.000000e+00> : vector<8xf32>
    %10 = vector.multi_reduction <add>, %9, %cst_9 [1] : vector<8x32xf32> to vector<8xf32>
    %11 = vector.shape_cast %10 : vector<8xf32> to vector<8x1xf32>
    %cst_10 = arith.constant 3.200000e+01 : f32
    %12 = vector.broadcast %cst_10 : f32 to vector<8x1xf32>
    %13 = arith.divf %11, %12 : vector<8x1xf32>
    %14 = vector.broadcast %13 : vector<8x1xf32> to vector<8x32xf32>
    %15 = arith.subf %9, %14 : vector<8x32xf32>
    %16 = arith.mulf %15, %15 : vector<8x32xf32>
    %cst_11 = arith.constant dense<0.000000e+00> : vector<8xf32>
    %17 = vector.multi_reduction <add>, %16, %cst_11 [1] : vector<8x32xf32> to vector<8xf32>
    %18 = vector.shape_cast %17 : vector<8xf32> to vector<8x1xf32>
    %cst_12 = arith.constant 3.200000e+01 : f32
    %19 = vector.broadcast %cst_12 : f32 to vector<8x1xf32>
    %20 = arith.divf %18, %19 : vector<8x1xf32>
    %21 = vector.broadcast %13 : vector<8x1xf32> to vector<8x32xf32>
    %22 = arith.subf %9, %21 : vector<8x32xf32>
    %cst_13 = arith.constant 9.99999974E-6 : f32
    %23 = vector.broadcast %cst_13 : f32 to vector<8x1xf32>
    %24 = arith.addf %20, %23 : vector<8x1xf32>
    %25 = math.rsqrt %24 : vector<8x1xf32>
    %26 = vector.broadcast %25 : vector<8x1xf32> to vector<8x32xf32>
    %27 = arith.mulf %22, %26 : vector<8x32xf32>
    %c0_14 = arith.constant 0 : index
    %c0_15 = arith.constant 0 : index
    %28 = vector.load %arg6[%c0_14, %c0_15] : memref<1x32xf32, #tpu.memory_space<vmem>>, vector<1x32xf32>
    %29 = vector.broadcast %28 : vector<1x32xf32> to vector<8x32xf32>
    %30 = arith.mulf %27, %29 : vector<8x32xf32>
    %c0_16 = arith.constant 0 : index
    %c0_17 = arith.constant 0 : index
    %31 = vector.load %arg7[%c0_16, %c0_17] : memref<1x32xf32, #tpu.memory_space<vmem>>, vector<1x32xf32>
    %32 = vector.broadcast %31 : vector<1x32xf32> to vector<8x32xf32>
    %33 = arith.addf %30, %32 : vector<8x32xf32>
    %c0_18 = arith.constant 0 : index
    %c0_19 = arith.constant 0 : index
    %c0_20 = arith.constant 0 : index
    %34 = vector.load %arg8[%c0_18, %c0_19, %c0_20] : memref<1x8x32xf32, #tpu.memory_space<vmem>>, vector<1x8x32xf32>
    %35 = vector.shape_cast %34 : vector<1x8x32xf32> to vector<8x32xf32>
    %36 = vector.shape_cast %33 : vector<8x32xf32> to vector<1x8x32xf32>
    tpu.vector_store %arg8[%c0_18, %c0_19, %c0_20], %36 {strides = array<i32>} : memref<1x8x32xf32, #tpu.memory_space<vmem>>, vector<1x8x32xf32>,
    return
  }
  func.func @transform_0(%arg0: i32, %arg1: i32) -> (i32, i32, i32) {
    %c0_i32 = arith.constant 0 : i32
    %c0_i32_0 = arith.constant 0 : i32
    return %arg0, %arg1, %c0_i32 : i32, i32, i32
  }
  func.func @transform_1(%arg0: i32, %arg1: i32) -> (i32, i32) {
    %c0_i32 = arith.constant 0 : i32
    %c0_i32_0 = arith.constant 0 : i32
    %c0_i32_1 = arith.constant 0 : i32
    return %c0_i32, %c0_i32_0 : i32, i32
  }
  func.func @transform_2(%arg0: i32, %arg1: i32) -> (i32, i32) {
    %c0_i32 = arith.constant 0 : i32
    %c0_i32_0 = arith.constant 0 : i32
    %c0_i32_1 = arith.constant 0 : i32
    return %c0_i32, %c0_i32_0 : i32, i32
  }
  func.func @transform_3(%arg0: i32, %arg1: i32) -> (i32, i32, i32) {
    %c0_i32 = arith.constant 0 : i32
    %c0_i32_0 = arith.constant 0 : i32
    return %arg0, %arg1, %c0_i32 : i32, i32, i32
  }
  func.func @transform_4(%arg0: i32, %arg1: i32) -> (i32, i32) {
    %c0_i32 = arith.constant 0 : i32
    %c0_i32_0 = arith.constant 0 : i32
    %c0_i32_1 = arith.constant 0 : i32
    return %c0_i32, %c0_i32_0 : i32, i32
  }
  func.func @transform_5(%arg0: i32, %arg1: i32) -> (i32, i32) {
    %c0_i32 = arith.constant 0 : i32
    %c0_i32_0 = arith.constant 0 : i32
    %c0_i32_1 = arith.constant 0 : i32
    return %c0_i32, %c0_i32_0 : i32, i32
  }
  func.func @transform_6(%arg0: i32, %arg1: i32) -> (i32, i32, i32) {
    %c0_i32 = arith.constant 0 : i32
    %c0_i32_0 = arith.constant 0 : i32
    return %arg0, %arg1, %c0_i32 : i32, i32, i32
  }
}

module attributes {stable_mosaic.version = 11 : i64} {
  func.func @_qkv_proj_kernel(%arg0: i32, %arg1: i32, %arg2: memref<1x8x32xbf16, #tpu.memory_space<vmem>>, %arg3: memref<1x8x32xbf16, #tpu.memory_space<vmem>>, %arg4: memref<1x8x32xbf16, #tpu.memory_space<vmem>>, %arg5: memref<32x32xbf16, #tpu.memory_space<vmem>>, %arg6: memref<32x32xbf16, #tpu.memory_space<vmem>>, %arg7: memref<32x32xbf16, #tpu.memory_space<vmem>>, %arg8: memref<1x32xf32, #tpu.memory_space<vmem>>, %arg9: memref<1x32xf32, #tpu.memory_space<vmem>>, %arg10: memref<1x32xf32, #tpu.memory_space<vmem>>, %arg11: memref<1x8x32xbf16, #tpu.memory_space<vmem>>, %arg12: memref<1x8x32xbf16, #tpu.memory_space<vmem>>, %arg13: memref<1x8x32xbf16, #tpu.memory_space<vmem>>) attributes {dimension_semantics = [#tpu.dimension_semantics<parallel>, #tpu.dimension_semantics<parallel>], iteration_bounds = array<i64: 2, 1>, scalar_prefetch = 0 : i64, scratch_operands = 0 : i64, tpu.core_type = #tpu.core_type<tc>, window_params = [{transform_indices = @transform_0, window_bounds = array<i64: 1, 8, 32>}, {transform_indices = @transform_1, window_bounds = array<i64: 1, 8, 32>}, {transform_indices = @transform_2, window_bounds = array<i64: 1, 8, 32>}, {pipeline_mode = #tpu.pipeline_mode<synchronous>, transform_indices = @transform_3, window_bounds = array<i64: 32, 32>}, {pipeline_mode = #tpu.pipeline_mode<synchronous>, transform_indices = @transform_4, window_bounds = array<i64: 32, 32>}, {pipeline_mode = #tpu.pipeline_mode<synchronous>, transform_indices = @transform_5, window_bounds = array<i64: 32, 32>}, {pipeline_mode = #tpu.pipeline_mode<synchronous>, transform_indices = @transform_6, window_bounds = array<i64: 1, 32>}, {pipeline_mode = #tpu.pipeline_mode<synchronous>, transform_indices = @transform_7, window_bounds = array<i64: 1, 32>}, {pipeline_mode = #tpu.pipeline_mode<synchronous>, transform_indices = @transform_8, window_bounds = array<i64: 1, 32>}, {transform_indices = @transform_9, window_bounds = array<i64: 1, 8, 32>}, {transform_indices = @transform_10, window_bounds = array<i64: 1, 8, 32>}, {transform_indices = @transform_11, window_bounds = array<i64: 1, 8, 32>}]} {
    %c0 = arith.constant 0 : index
    %c0_0 = arith.constant 0 : index
    %c0_1 = arith.constant 0 : index
    %0 = vector.load %arg2[%c0, %c0_0, %c0_1] : memref<1x8x32xbf16, #tpu.memory_space<vmem>>, vector<1x8x32xbf16>
    %1 = vector.shape_cast %0 : vector<1x8x32xbf16> to vector<8x32xbf16>
    %c0_2 = arith.constant 0 : index
    %c0_3 = arith.constant 0 : index
    %2 = vector.load %arg5[%c0_2, %c0_3] : memref<32x32xbf16, #tpu.memory_space<vmem>>, vector<32x32xbf16>
    %cst = arith.constant dense<0.000000e+00> : vector<8x32xf32>
    %3 = tpu.matmul %1, %2, %cst {dimension_numbers = #tpu.dot_dimension_numbers<[1], [0], [0], [1], [0, 0, 1, 1], [], []>} : vector<8x32xbf16>, vector<32x32xbf16>, vector<8x32xf32> -> vector<8x32xf32>
    %c0_4 = arith.constant 0 : index
    %c0_5 = arith.constant 0 : index
    %4 = vector.load %arg8[%c0_4, %c0_5] : memref<1x32xf32, #tpu.memory_space<vmem>>, vector<1x32xf32>
    %5 = vector.broadcast %4 : vector<1x32xf32> to vector<8x32xf32>
    %6 = arith.addf %3, %5 : vector<8x32xf32>
    %7 = arith.truncf %6 : vector<8x32xf32> to vector<8x32xbf16>
    %c0_6 = arith.constant 0 : index
    %c0_7 = arith.constant 0 : index
    %c0_8 = arith.constant 0 : index
    %8 = vector.load %arg11[%c0_6, %c0_7, %c0_8] : memref<1x8x32xbf16, #tpu.memory_space<vmem>>, vector<1x8x32xbf16>
    %9 = vector.shape_cast %8 : vector<1x8x32xbf16> to vector<8x32xbf16>
    %10 = vector.shape_cast %7 : vector<8x32xbf16> to vector<1x8x32xbf16>
    tpu.vector_store %arg11[%c0_6, %c0_7, %c0_8], %10 {strides = array<i32>} : memref<1x8x32xbf16, #tpu.memory_space<vmem>>, vector<1x8x32xbf16>,
    %c0_9 = arith.constant 0 : index
    %c0_10 = arith.constant 0 : index
    %c0_11 = arith.constant 0 : index
    %11 = vector.load %arg3[%c0_9, %c0_10, %c0_11] : memref<1x8x32xbf16, #tpu.memory_space<vmem>>, vector<1x8x32xbf16>
    %12 = vector.shape_cast %11 : vector<1x8x32xbf16> to vector<8x32xbf16>
    %c0_12 = arith.constant 0 : index
    %c0_13 = arith.constant 0 : index
    %13 = vector.load %arg6[%c0_12, %c0_13] : memref<32x32xbf16, #tpu.memory_space<vmem>>, vector<32x32xbf16>
    %cst_14 = arith.constant dense<0.000000e+00> : vector<8x32xf32>
    %14 = tpu.matmul %12, %13, %cst_14 {dimension_numbers = #tpu.dot_dimension_numbers<[1], [0], [0], [1], [0, 0, 1, 1], [], []>} : vector<8x32xbf16>, vector<32x32xbf16>, vector<8x32xf32> -> vector<8x32xf32>
    %c0_15 = arith.constant 0 : index
    %c0_16 = arith.constant 0 : index
    %15 = vector.load %arg9[%c0_15, %c0_16] : memref<1x32xf32, #tpu.memory_space<vmem>>, vector<1x32xf32>
    %16 = vector.broadcast %15 : vector<1x32xf32> to vector<8x32xf32>
    %17 = arith.addf %14, %16 : vector<8x32xf32>
    %18 = arith.truncf %17 : vector<8x32xf32> to vector<8x32xbf16>
    %c0_17 = arith.constant 0 : index
    %c0_18 = arith.constant 0 : index
    %c0_19 = arith.constant 0 : index
    %19 = vector.load %arg12[%c0_17, %c0_18, %c0_19] : memref<1x8x32xbf16, #tpu.memory_space<vmem>>, vector<1x8x32xbf16>
    %20 = vector.shape_cast %19 : vector<1x8x32xbf16> to vector<8x32xbf16>
    %21 = vector.shape_cast %18 : vector<8x32xbf16> to vector<1x8x32xbf16>
    tpu.vector_store %arg12[%c0_17, %c0_18, %c0_19], %21 {strides = array<i32>} : memref<1x8x32xbf16, #tpu.memory_space<vmem>>, vector<1x8x32xbf16>,
    %c0_20 = arith.constant 0 : index
    %c0_21 = arith.constant 0 : index
    %c0_22 = arith.constant 0 : index
    %22 = vector.load %arg4[%c0_20, %c0_21, %c0_22] : memref<1x8x32xbf16, #tpu.memory_space<vmem>>, vector<1x8x32xbf16>
    %23 = vector.shape_cast %22 : vector<1x8x32xbf16> to vector<8x32xbf16>
    %c0_23 = arith.constant 0 : index
    %c0_24 = arith.constant 0 : index
    %24 = vector.load %arg7[%c0_23, %c0_24] : memref<32x32xbf16, #tpu.memory_space<vmem>>, vector<32x32xbf16>
    %cst_25 = arith.constant dense<0.000000e+00> : vector<8x32xf32>
    %25 = tpu.matmul %23, %24, %cst_25 {dimension_numbers = #tpu.dot_dimension_numbers<[1], [0], [0], [1], [0, 0, 1, 1], [], []>} : vector<8x32xbf16>, vector<32x32xbf16>, vector<8x32xf32> -> vector<8x32xf32>
    %c0_26 = arith.constant 0 : index
    %c0_27 = arith.constant 0 : index
    %26 = vector.load %arg10[%c0_26, %c0_27] : memref<1x32xf32, #tpu.memory_space<vmem>>, vector<1x32xf32>
    %27 = vector.broadcast %26 : vector<1x32xf32> to vector<8x32xf32>
    %28 = arith.addf %25, %27 : vector<8x32xf32>
    %29 = arith.truncf %28 : vector<8x32xf32> to vector<8x32xbf16>
    %c0_28 = arith.constant 0 : index
    %c0_29 = arith.constant 0 : index
    %c0_30 = arith.constant 0 : index
    %30 = vector.load %arg13[%c0_28, %c0_29, %c0_30] : memref<1x8x32xbf16, #tpu.memory_space<vmem>>, vector<1x8x32xbf16>
    %31 = vector.shape_cast %30 : vector<1x8x32xbf16> to vector<8x32xbf16>
    %32 = vector.shape_cast %29 : vector<8x32xbf16> to vector<1x8x32xbf16>
    tpu.vector_store %arg13[%c0_28, %c0_29, %c0_30], %32 {strides = array<i32>} : memref<1x8x32xbf16, #tpu.memory_space<vmem>>, vector<1x8x32xbf16>,
    return
  }
  func.func @transform_0(%arg0: i32, %arg1: i32) -> (i32, i32, i32) {
    %c0_i32 = arith.constant 0 : i32
    %c0_i32_0 = arith.constant 0 : i32
    return %arg0, %arg1, %c0_i32 : i32, i32, i32
  }
  func.func @transform_1(%arg0: i32, %arg1: i32) -> (i32, i32, i32) {
    %c0_i32 = arith.constant 0 : i32
    %c0_i32_0 = arith.constant 0 : i32
    return %arg0, %arg1, %c0_i32 : i32, i32, i32
  }
  func.func @transform_2(%arg0: i32, %arg1: i32) -> (i32, i32, i32) {
    %c0_i32 = arith.constant 0 : i32
    %c0_i32_0 = arith.constant 0 : i32
    return %arg0, %arg1, %c0_i32 : i32, i32, i32
  }
  func.func @transform_3(%arg0: i32, %arg1: i32) -> (i32, i32) {
    %c0_i32 = arith.constant 0 : i32
    %c0_i32_0 = arith.constant 0 : i32
    %c0_i32_1 = arith.constant 0 : i32
    return %c0_i32, %c0_i32_0 : i32, i32
  }
  func.func @transform_4(%arg0: i32, %arg1: i32) -> (i32, i32) {
    %c0_i32 = arith.constant 0 : i32
    %c0_i32_0 = arith.constant 0 : i32
    %c0_i32_1 = arith.constant 0 : i32
    return %c0_i32, %c0_i32_0 : i32, i32
  }
  func.func @transform_5(%arg0: i32, %arg1: i32) -> (i32, i32) {
    %c0_i32 = arith.constant 0 : i32
    %c0_i32_0 = arith.constant 0 : i32
    %c0_i32_1 = arith.constant 0 : i32
    return %c0_i32, %c0_i32_0 : i32, i32
  }
  func.func @transform_6(%arg0: i32, %arg1: i32) -> (i32, i32) {
    %c0_i32 = arith.constant 0 : i32
    %c0_i32_0 = arith.constant 0 : i32
    %c0_i32_1 = arith.constant 0 : i32
    return %c0_i32, %c0_i32_0 : i32, i32
  }
  func.func @transform_7(%arg0: i32, %arg1: i32) -> (i32, i32) {
    %c0_i32 = arith.constant 0 : i32
    %c0_i32_0 = arith.constant 0 : i32
    %c0_i32_1 = arith.constant 0 : i32
    return %c0_i32, %c0_i32_0 : i32, i32
  }
  func.func @transform_8(%arg0: i32, %arg1: i32) -> (i32, i32) {
    %c0_i32 = arith.constant 0 : i32
    %c0_i32_0 = arith.constant 0 : i32
    %c0_i32_1 = arith.constant 0 : i32
    return %c0_i32, %c0_i32_0 : i32, i32
  }
  func.func @transform_9(%arg0: i32, %arg1: i32) -> (i32, i32, i32) {
    %c0_i32 = arith.constant 0 : i32
    %c0_i32_0 = arith.constant 0 : i32
    return %arg0, %arg1, %c0_i32 : i32, i32, i32
  }
  func.func @transform_10(%arg0: i32, %arg1: i32) -> (i32, i32, i32) {
    %c0_i32 = arith.constant 0 : i32
    %c0_i32_0 = arith.constant 0 : i32
    return %arg0, %arg1, %c0_i32 : i32, i32, i32
  }
  func.func @transform_11(%arg0: i32, %arg1: i32) -> (i32, i32, i32) {
    %c0_i32 = arith.constant 0 : i32
    %c0_i32_0 = arith.constant 0 : i32
    return %arg0, %arg1, %c0_i32 : i32, i32, i32
  }
}

module attributes {stable_mosaic.version = 11 : i64} {
  func.func @_attention_kernel(%arg0: i32, %arg1: i32, %arg2: memref<1x8x32xbf16, #tpu.memory_space<vmem>>, %arg3: memref<1x8x32xbf16, #tpu.memory_space<vmem>>, %arg4: memref<1x8x32xbf16, #tpu.memory_space<vmem>>, %arg5: memref<1x8x8xi8, #tpu.memory_space<vmem>>, %arg6: memref<1x8x32xbf16, #tpu.memory_space<vmem>>, %arg7: memref<1x4x8x8xbf16, #tpu.memory_space<vmem>>) attributes {dimension_semantics = [#tpu.dimension_semantics<parallel>, #tpu.dimension_semantics<parallel>], iteration_bounds = array<i64: 2, 1>, scalar_prefetch = 0 : i64, scratch_operands = 0 : i64, tpu.core_type = #tpu.core_type<tc>, window_params = [{transform_indices = @transform_0, window_bounds = array<i64: 1, 8, 32>}, {transform_indices = @transform_1, window_bounds = array<i64: 1, 8, 32>}, {transform_indices = @transform_2, window_bounds = array<i64: 1, 8, 32>}, {transform_indices = @transform_3, window_bounds = array<i64: 1, 8, 8>}, {transform_indices = @transform_4, window_bounds = array<i64: 1, 8, 32>}, {transform_indices = @transform_5, window_bounds = array<i64: 1, 4, 8, 8>}]} {
    %c0 = arith.constant 0 : index
    %c0_0 = arith.constant 0 : index
    %c0_1 = arith.constant 0 : index
    %0 = vector.load %arg2[%c0, %c0_0, %c0_1] : memref<1x8x32xbf16, #tpu.memory_space<vmem>>, vector<1x8x32xbf16>
    %1 = vector.shape_cast %0 : vector<1x8x32xbf16> to vector<8x32xbf16>
    %c0_2 = arith.constant 0 : index
    %c0_3 = arith.constant 0 : index
    %c0_4 = arith.constant 0 : index
    %2 = vector.load %arg3[%c0_2, %c0_3, %c0_4] : memref<1x8x32xbf16, #tpu.memory_space<vmem>>, vector<1x8x32xbf16>
    %3 = vector.shape_cast %2 : vector<1x8x32xbf16> to vector<8x32xbf16>
    %c0_5 = arith.constant 0 : index
    %c0_6 = arith.constant 0 : index
    %c0_7 = arith.constant 0 : index
    %4 = vector.load %arg4[%c0_5, %c0_6, %c0_7] : memref<1x8x32xbf16, #tpu.memory_space<vmem>>, vector<1x8x32xbf16>
    %5 = vector.shape_cast %4 : vector<1x8x32xbf16> to vector<8x32xbf16>
    %c0_8 = arith.constant 0 : index
    %c0_9 = arith.constant 0 : index
    %c0_10 = arith.constant 0 : index
    %6 = vector.load %arg5[%c0_8, %c0_9, %c0_10] : memref<1x8x8xi8, #tpu.memory_space<vmem>>, vector<1x8x8xi8>
    %7 = vector.shape_cast %6 : vector<1x8x8xi8> to vector<8x8xi8>
    %c0_i8 = arith.constant 0 : i8
    %8 = vector.broadcast %c0_i8 : i8 to vector<8x8xi8>
    %9 = arith.cmpi ne, %7, %8 : vector<8x8xi8>
    %10 = vector.extract_strided_slice %1 {offsets = [0, 0], sizes = [8, 8], strides = [1, 1]} : vector<8x32xbf16> to vector<8x8xbf16>
    %11 = vector.extract_strided_slice %3 {offsets = [0, 0], sizes = [8, 8], strides = [1, 1]} : vector<8x32xbf16> to vector<8x8xbf16>
    %12 = vector.extract_strided_slice %5 {offsets = [0, 0], sizes = [8, 8], strides = [1, 1]} : vector<8x32xbf16> to vector<8x8xbf16>
    %cst = arith.constant dense<0.000000e+00> : vector<8x8xf32>
    %13 = tpu.matmul %10, %11, %cst {dimension_numbers = #tpu.dot_dimension_numbers<[1], [1], [0], [0], [0, 0, 1, 0], [], []>} : vector<8x8xbf16>, vector<8x8xbf16>, vector<8x8xf32> -> vector<8x8xf32>
    %cst_11 = arith.constant -1.000000e+09 : f32
    %14 = vector.broadcast %cst_11 : f32 to vector<8x8xf32>
    %15 = arith.select %9, %14, %13 : vector<8x8xi1>, vector<8x8xf32>
    %cst_12 = arith.constant dense<0xFF800000> : vector<8xf32>
    %16 = vector.multi_reduction <maximumf>, %15, %cst_12 [1] : vector<8x8xf32> to vector<8xf32>
    %17 = vector.shape_cast %16 : vector<8xf32> to vector<8x1xf32>
    %18 = vector.broadcast %17 : vector<8x1xf32> to vector<8x8xf32>
    %19 = arith.subf %15, %18 : vector<8x8xf32>
    %20 = math.exp %19 : vector<8x8xf32>
    %cst_13 = arith.constant dense<0.000000e+00> : vector<8xf32>
    %21 = vector.multi_reduction <add>, %20, %cst_13 [1] : vector<8x8xf32> to vector<8xf32>
    %22 = vector.shape_cast %21 : vector<8xf32> to vector<8x1xf32>
    %23 = tpu.reciprocal %22 : vector<8x1xf32> -> vector<8x1xf32>
    %24 = vector.broadcast %23 : vector<8x1xf32> to vector<8x8xf32>
    %25 = arith.mulf %20, %24 : vector<8x8xf32>
    %26 = arith.truncf %25 : vector<8x8xf32> to vector<8x8xbf16>
    %c0_14 = arith.constant 0 : index
    %c0_15 = arith.constant 0 : index
    %c0_16 = arith.constant 0 : index
    %c0_17 = arith.constant 0 : index
    %27 = vector.load %arg7[%c0_14, %c0_15, %c0_16, %c0_17] : memref<1x4x8x8xbf16, #tpu.memory_space<vmem>>, vector<1x1x8x8xbf16>
    %28 = vector.shape_cast %27 : vector<1x1x8x8xbf16> to vector<8x8xbf16>
    %29 = vector.shape_cast %26 : vector<8x8xbf16> to vector<1x1x8x8xbf16>
    tpu.vector_store %arg7[%c0_14, %c0_15, %c0_16, %c0_17], %29 {strides = array<i32>} : memref<1x4x8x8xbf16, #tpu.memory_space<vmem>>, vector<1x1x8x8xbf16>,
    %cst_18 = arith.constant dense<0.000000e+00> : vector<8x8xf32>
    %30 = tpu.matmul %26, %12, %cst_18 {dimension_numbers = #tpu.dot_dimension_numbers<[1], [0], [0], [1], [0, 0, 1, 1], [], []>} : vector<8x8xbf16>, vector<8x8xbf16>, vector<8x8xf32> -> vector<8x8xf32>
    %31 = vector.extract_strided_slice %1 {offsets = [0, 8], sizes = [8, 8], strides = [1, 1]} : vector<8x32xbf16> to vector<8x8xbf16>
    %32 = vector.extract_strided_slice %3 {offsets = [0, 8], sizes = [8, 8], strides = [1, 1]} : vector<8x32xbf16> to vector<8x8xbf16>
    %33 = vector.extract_strided_slice %5 {offsets = [0, 8], sizes = [8, 8], strides = [1, 1]} : vector<8x32xbf16> to vector<8x8xbf16>
    %cst_19 = arith.constant dense<0.000000e+00> : vector<8x8xf32>
    %34 = tpu.matmul %31, %32, %cst_19 {dimension_numbers = #tpu.dot_dimension_numbers<[1], [1], [0], [0], [0, 0, 1, 0], [], []>} : vector<8x8xbf16>, vector<8x8xbf16>, vector<8x8xf32> -> vector<8x8xf32>
    %cst_20 = arith.constant -1.000000e+09 : f32
    %35 = vector.broadcast %cst_20 : f32 to vector<8x8xf32>
    %36 = arith.select %9, %35, %34 : vector<8x8xi1>, vector<8x8xf32>
    %cst_21 = arith.constant dense<0xFF800000> : vector<8xf32>
    %37 = vector.multi_reduction <maximumf>, %36, %cst_21 [1] : vector<8x8xf32> to vector<8xf32>
    %38 = vector.shape_cast %37 : vector<8xf32> to vector<8x1xf32>
    %39 = vector.broadcast %38 : vector<8x1xf32> to vector<8x8xf32>
    %40 = arith.subf %36, %39 : vector<8x8xf32>
    %41 = math.exp %40 : vector<8x8xf32>
    %cst_22 = arith.constant dense<0.000000e+00> : vector<8xf32>
    %42 = vector.multi_reduction <add>, %41, %cst_22 [1] : vector<8x8xf32> to vector<8xf32>
    %43 = vector.shape_cast %42 : vector<8xf32> to vector<8x1xf32>
    %44 = tpu.reciprocal %43 : vector<8x1xf32> -> vector<8x1xf32>
    %45 = vector.broadcast %44 : vector<8x1xf32> to vector<8x8xf32>
    %46 = arith.mulf %41, %45 : vector<8x8xf32>
    %47 = arith.truncf %46 : vector<8x8xf32> to vector<8x8xbf16>
    %c0_23 = arith.constant 0 : index
    %c1 = arith.constant 1 : index
    %c0_24 = arith.constant 0 : index
    %c0_25 = arith.constant 0 : index
    %48 = vector.load %arg7[%c0_23, %c1, %c0_24, %c0_25] : memref<1x4x8x8xbf16, #tpu.memory_space<vmem>>, vector<1x1x8x8xbf16>
    %49 = vector.shape_cast %48 : vector<1x1x8x8xbf16> to vector<8x8xbf16>
    %50 = vector.shape_cast %47 : vector<8x8xbf16> to vector<1x1x8x8xbf16>
    tpu.vector_store %arg7[%c0_23, %c1, %c0_24, %c0_25], %50 {strides = array<i32>} : memref<1x4x8x8xbf16, #tpu.memory_space<vmem>>, vector<1x1x8x8xbf16>,
    %cst_26 = arith.constant dense<0.000000e+00> : vector<8x8xf32>
    %51 = tpu.matmul %47, %33, %cst_26 {dimension_numbers = #tpu.dot_dimension_numbers<[1], [0], [0], [1], [0, 0, 1, 1], [], []>} : vector<8x8xbf16>, vector<8x8xbf16>, vector<8x8xf32> -> vector<8x8xf32>
    %52 = vector.extract_strided_slice %1 {offsets = [0, 16], sizes = [8, 8], strides = [1, 1]} : vector<8x32xbf16> to vector<8x8xbf16>
    %53 = vector.extract_strided_slice %3 {offsets = [0, 16], sizes = [8, 8], strides = [1, 1]} : vector<8x32xbf16> to vector<8x8xbf16>
    %54 = vector.extract_strided_slice %5 {offsets = [0, 16], sizes = [8, 8], strides = [1, 1]} : vector<8x32xbf16> to vector<8x8xbf16>
    %cst_27 = arith.constant dense<0.000000e+00> : vector<8x8xf32>
    %55 = tpu.matmul %52, %53, %cst_27 {dimension_numbers = #tpu.dot_dimension_numbers<[1], [1], [0], [0], [0, 0, 1, 0], [], []>} : vector<8x8xbf16>, vector<8x8xbf16>, vector<8x8xf32> -> vector<8x8xf32>
    %cst_28 = arith.constant -1.000000e+09 : f32
    %56 = vector.broadcast %cst_28 : f32 to vector<8x8xf32>
    %57 = arith.select %9, %56, %55 : vector<8x8xi1>, vector<8x8xf32>
    %cst_29 = arith.constant dense<0xFF800000> : vector<8xf32>
    %58 = vector.multi_reduction <maximumf>, %57, %cst_29 [1] : vector<8x8xf32> to vector<8xf32>
    %59 = vector.shape_cast %58 : vector<8xf32> to vector<8x1xf32>
    %60 = vector.broadcast %59 : vector<8x1xf32> to vector<8x8xf32>
    %61 = arith.subf %57, %60 : vector<8x8xf32>
    %62 = math.exp %61 : vector<8x8xf32>
    %cst_30 = arith.constant dense<0.000000e+00> : vector<8xf32>
    %63 = vector.multi_reduction <add>, %62, %cst_30 [1] : vector<8x8xf32> to vector<8xf32>
    %64 = vector.shape_cast %63 : vector<8xf32> to vector<8x1xf32>
    %65 = tpu.reciprocal %64 : vector<8x1xf32> -> vector<8x1xf32>
    %66 = vector.broadcast %65 : vector<8x1xf32> to vector<8x8xf32>
    %67 = arith.mulf %62, %66 : vector<8x8xf32>
    %68 = arith.truncf %67 : vector<8x8xf32> to vector<8x8xbf16>
    %c0_31 = arith.constant 0 : index
    %c2 = arith.constant 2 : index
    %c0_32 = arith.constant 0 : index
    %c0_33 = arith.constant 0 : index
    %69 = vector.load %arg7[%c0_31, %c2, %c0_32, %c0_33] : memref<1x4x8x8xbf16, #tpu.memory_space<vmem>>, vector<1x1x8x8xbf16>
    %70 = vector.shape_cast %69 : vector<1x1x8x8xbf16> to vector<8x8xbf16>
    %71 = vector.shape_cast %68 : vector<8x8xbf16> to vector<1x1x8x8xbf16>
    tpu.vector_store %arg7[%c0_31, %c2, %c0_32, %c0_33], %71 {strides = array<i32>} : memref<1x4x8x8xbf16, #tpu.memory_space<vmem>>, vector<1x1x8x8xbf16>,
    %cst_34 = arith.constant dense<0.000000e+00> : vector<8x8xf32>
    %72 = tpu.matmul %68, %54, %cst_34 {dimension_numbers = #tpu.dot_dimension_numbers<[1], [0], [0], [1], [0, 0, 1, 1], [], []>} : vector<8x8xbf16>, vector<8x8xbf16>, vector<8x8xf32> -> vector<8x8xf32>
    %73 = vector.extract_strided_slice %1 {offsets = [0, 24], sizes = [8, 8], strides = [1, 1]} : vector<8x32xbf16> to vector<8x8xbf16>
    %74 = vector.extract_strided_slice %3 {offsets = [0, 24], sizes = [8, 8], strides = [1, 1]} : vector<8x32xbf16> to vector<8x8xbf16>
    %75 = vector.extract_strided_slice %5 {offsets = [0, 24], sizes = [8, 8], strides = [1, 1]} : vector<8x32xbf16> to vector<8x8xbf16>
    %cst_35 = arith.constant dense<0.000000e+00> : vector<8x8xf32>
    %76 = tpu.matmul %73, %74, %cst_35 {dimension_numbers = #tpu.dot_dimension_numbers<[1], [1], [0], [0], [0, 0, 1, 0], [], []>} : vector<8x8xbf16>, vector<8x8xbf16>, vector<8x8xf32> -> vector<8x8xf32>
    %cst_36 = arith.constant -1.000000e+09 : f32
    %77 = vector.broadcast %cst_36 : f32 to vector<8x8xf32>
    %78 = arith.select %9, %77, %76 : vector<8x8xi1>, vector<8x8xf32>
    %cst_37 = arith.constant dense<0xFF800000> : vector<8xf32>
    %79 = vector.multi_reduction <maximumf>, %78, %cst_37 [1] : vector<8x8xf32> to vector<8xf32>
    %80 = vector.shape_cast %79 : vector<8xf32> to vector<8x1xf32>
    %81 = vector.broadcast %80 : vector<8x1xf32> to vector<8x8xf32>
    %82 = arith.subf %78, %81 : vector<8x8xf32>
    %83 = math.exp %82 : vector<8x8xf32>
    %cst_38 = arith.constant dense<0.000000e+00> : vector<8xf32>
    %84 = vector.multi_reduction <add>, %83, %cst_38 [1] : vector<8x8xf32> to vector<8xf32>
    %85 = vector.shape_cast %84 : vector<8xf32> to vector<8x1xf32>
    %86 = tpu.reciprocal %85 : vector<8x1xf32> -> vector<8x1xf32>
    %87 = vector.broadcast %86 : vector<8x1xf32> to vector<8x8xf32>
    %88 = arith.mulf %83, %87 : vector<8x8xf32>
    %89 = arith.truncf %88 : vector<8x8xf32> to vector<8x8xbf16>
    %c0_39 = arith.constant 0 : index
    %c3 = arith.constant 3 : index
    %c0_40 = arith.constant 0 : index
    %c0_41 = arith.constant 0 : index
    %90 = vector.load %arg7[%c0_39, %c3, %c0_40, %c0_41] : memref<1x4x8x8xbf16, #tpu.memory_space<vmem>>, vector<1x1x8x8xbf16>
    %91 = vector.shape_cast %90 : vector<1x1x8x8xbf16> to vector<8x8xbf16>
    %92 = vector.shape_cast %89 : vector<8x8xbf16> to vector<1x1x8x8xbf16>
    tpu.vector_store %arg7[%c0_39, %c3, %c0_40, %c0_41], %92 {strides = array<i32>} : memref<1x4x8x8xbf16, #tpu.memory_space<vmem>>, vector<1x1x8x8xbf16>,
    %cst_42 = arith.constant dense<0.000000e+00> : vector<8x8xf32>
    %93 = tpu.matmul %89, %75, %cst_42 {dimension_numbers = #tpu.dot_dimension_numbers<[1], [0], [0], [1], [0, 0, 1, 1], [], []>} : vector<8x8xbf16>, vector<8x8xbf16>, vector<8x8xf32> -> vector<8x8xf32>
    %94 = tpu.concatenate %30, %51, %72, %93 in 1 : vector<8x8xf32>, vector<8x8xf32>, vector<8x8xf32>, vector<8x8xf32> -> vector<8x32xf32>
    %95 = arith.truncf %94 : vector<8x32xf32> to vector<8x32xbf16>
    %c0_43 = arith.constant 0 : index
    %c0_44 = arith.constant 0 : index
    %c0_45 = arith.constant 0 : index
    %96 = vector.load %arg6[%c0_43, %c0_44, %c0_45] : memref<1x8x32xbf16, #tpu.memory_space<vmem>>, vector<1x8x32xbf16>
    %97 = vector.shape_cast %96 : vector<1x8x32xbf16> to vector<8x32xbf16>
    %98 = vector.shape_cast %95 : vector<8x32xbf16> to vector<1x8x32xbf16>
    tpu.vector_store %arg6[%c0_43, %c0_44, %c0_45], %98 {strides = array<i32>} : memref<1x8x32xbf16, #tpu.memory_space<vmem>>, vector<1x8x32xbf16>,
    return
  }
  func.func @transform_0(%arg0: i32, %arg1: i32) -> (i32, i32, i32) {
    %c0_i32 = arith.constant 0 : i32
    %c0_i32_0 = arith.constant 0 : i32
    return %arg0, %arg1, %c0_i32 : i32, i32, i32
  }
  func.func @transform_1(%arg0: i32, %arg1: i32) -> (i32, i32, i32) {
    %c0_i32 = arith.constant 0 : i32
    %c0_i32_0 = arith.constant 0 : i32
    %c0_i32_1 = arith.constant 0 : i32
    return %arg0, %c0_i32, %c0_i32_0 : i32, i32, i32
  }
  func.func @transform_2(%arg0: i32, %arg1: i32) -> (i32, i32, i32) {
    %c0_i32 = arith.constant 0 : i32
    %c0_i32_0 = arith.constant 0 : i32
    %c0_i32_1 = arith.constant 0 : i32
    return %arg0, %c0_i32, %c0_i32_0 : i32, i32, i32
  }
  func.func @transform_3(%arg0: i32, %arg1: i32) -> (i32, i32, i32) {
    %c0_i32 = arith.constant 0 : i32
    %c0_i32_0 = arith.constant 0 : i32
    return %arg0, %arg1, %c0_i32 : i32, i32, i32
  }
  func.func @transform_4(%arg0: i32, %arg1: i32) -> (i32, i32, i32) {
    %c0_i32 = arith.constant 0 : i32
    %c0_i32_0 = arith.constant 0 : i32
    return %arg0, %arg1, %c0_i32 : i32, i32, i32
  }
  func.func @transform_5(%arg0: i32, %arg1: i32) -> (i32, i32, i32, i32) {
    %c0_i32 = arith.constant 0 : i32
    %c0_i32_0 = arith.constant 0 : i32
    %c0_i32_1 = arith.constant 0 : i32
    return %arg0, %c0_i32, %arg1, %c0_i32_0 : i32, i32, i32, i32
  }
}

</mosaic_0001>

<bundles_post_ra>
// kernel: multi_head_attention.5
= control target key start
LH: loop header
LB: loop body
LE: loop exit
PB: predicated region body
PF: predicated region fallthrough
CT: control target
= control target key end

     0   :  { %11 = vsyncpa [#allocation3], 0  ;;  %s845_s0 = inlined_call_operand.vmem [shape: bf16[2,8,32], index: 0, kind: input, shape index: {}]   ;;  %s846_s1 = inlined_call_operand.vmem [shape: bf16[32,32], index: 1, kind: input, shape index: {}]   ;;  %s847_s2 = inlined_call_operand.vmem [shape: f32[1,32], index: 2, kind: input, shape index: {}]   ;;  %s848_s3 = inlined_call_operand.vmem [shape: f32[2,8,32], index: 3, kind: input, shape index: {}]   ;;  %s849_s4 = inlined_call_operand.vmem [shape: f32[1,32], index: 4, kind: input, shape index: {}]   ;;  %s850_s5 = inlined_call_operand.vmem [shape: f32[1,32], index: 5, kind: input, shape index: {}]   ;;  %s851_s6 = inlined_call_operand.hbm [shape: f32[2,8,32], index: 6, kind: output, shape index: {}]  }
   0x1   :  { %13 = vsyncpa [#allocation3 + $0x1], 0  ;;  %s711_s21 = smov 0   ;;  %s713_s22 = smov 0  }
   0x2   :  { %s715_s23 = smov 0   ;;  %s717_s24 = smov 0  }
   0x3   :  { %s719_s25 = smov 0   ;;  %s721_s26 = smov 0  }
   0x4 LB: > { %s503_s27 = sadd.s32 4294967295, %s671_s26   ;;  %s504_s28 = sadd.s32 4294967294, %s671_s26   ;;  %s671_s26 = sphi %s721_s26, %s19_s26   ;;  %s667_s25 = sphi %s719_s25, %s858_s25   ;;  %s663_s24 = sphi %s717_s24, %s857_s24   ;;  %s659_s23 = sphi %s715_s23, %s856_s23   ;;  %s655_s22 = sphi %s713_s22, %s855_s22   ;;  %s651_s21 = sphi %s711_s21, %s854_s21  }
   0x5   : > { %s31_s29 = sadd.s32 1, %s667_s25  ;;  %s180_s30 = sadd.s32 1, %s659_s23 }
   0x6   : > { %p33_p0 = scmp.ge.s32.totalorder %s31_s29, 2  ;;  %p190_p1 = scmp.ne.s32.totalorder %s659_s23, %s655_s22 }
   0x7   : > { %p191_p2 = scmp.eq.s32.totalorder %s503_s27, 1  ;;  %p196_p3 = scmp.ne.s32.totalorder %s655_s22, %s651_s21 }
   0x8   : > { %s860_s29 = smov (%p33_p0, %s31_s29), 0  ;;  %p197_p5 = scmp.eq.s32.totalorder %s504_s28, 1 }
   0x9   : > { %p751_p4 = por %p191_p2, %p190_p1  ;;  %s175_s8 = ssub.s32 %s667_s25, %s860_s29 }
   0xa   : > { %p507_p6 = scmp.ge.s32.totalorder %s671_s26, 1  ;;  %p178_p7 = scmp.eq.s32.totalorder %s175_s8, 0 }
   0xb   : > { %p758_p8 = por %p197_p5, %p196_p3  ;;  %p247_p9 = scmp.lt.s32.totalorder %s671_s26, 3 }
   0xc   : > { %s764_s10 = scalar_select %p178_p7, %s659_s23, %s180_s30  }
   0xd   : > { %p248_p10 = pnand %p507_p6, %p247_p9 }
   0xe   : > { %v589_v0 = vld [vmem:[%s846_s1] sm:$0xff] (!%p248_p10)   ;;  %v673_v1 = vmov (!%p248_p10), 0.0   ;;  %v590_v2 = vld [vmem:[%s846_s1 + $0x8] sm:$0xff] (!%p248_p10)   ;;  %vm674_vm0 = vmmov (!%p248_p10), 0   ;;  %p286_p11 = scmp.lt.s32.totalorder (!%p248_p10), %s663_s24, 1  ;;  %vm325_vm1 = vcmask (!%p248_p10), 261120  }
   0xf   : > { %251 = sbr.rel (%p248_p10) target bundleno = 570 (0x23a), region = 44  ;;  %524 = vmatprep.subr.bf16.mxu0 (!%p248_p10), %v673_v1  ;;  %528 = vmatprep.mubr.msk.bf16.mxu0 (!%p248_p10), %vm674_vm0, %v673_v1  ;;  %v511_v4 = vld [vmem:[%s847_s2] ss:$0 sm:$0xff] (!%p248_p10)  ;;  %s283_s12 = sand.u32 (!%p248_p10), 1, %s655_s22  }
  0x10   : > { %525 = vmatpush3.bf16.msra.mxu0 (!%p248_p10), %v589_v0  ;;  %s508_s13 = sshll.u32 (!%p248_p10), %s283_s12, 3  ;;  %v515_v22 = vld [vmem:[%s849_s4] ss:$0 sm:$0xff] (!%p248_p10)  ;;  %s518_s18 = sshll.u32 (!%p248_p10), %s663_s24, 7 }
  0x11   : > { %526 = vmatprep.subr.bf16.mxu0 (!%p248_p10), %v673_v1  ;;  %v516_v24 = vld [vmem:[%s850_s5] ss:$0 sm:$0xff] (!%p248_p10)  ;;  %s403_s8 = scalar_lea.sflag (!%p248_p10), [#allocation3], %s283_s12 }
  0x14   : > { %527 = vmatpush3.bf16.msra.mxu0 (!%p248_p10), %v590_v2 }
  0x16   : > { %s287_s15 = scalar_select %p286_p11, %s663_s24, 1 }
  0x17   : > { %s675_s24 = smov [#allocation2]  }
  0x18   : > { %s509_s16 = sshll.u32 %s287_s15, 2  ;;  %s510_s20 = sshll.u32 %s287_s15, 3 }
  0x19   : > { %s292_s19 = scalar_lea.vmem %s845_s0, %s509_s16  ;;  %s299_s30 = scalar_lea.vmem %s848_s3, %s510_s20 }
  0x1a   : > { %v301_v3 = vld [vmem:[%s292_s19] sm:$0xf]  ;;  %s285_s19 = scalar_lea.vmem [#allocation2], %s508_s13  ;;  %s597_s13 = sshll.u32 %s675_s24, 4  ;;  %s598_s13 = int_to_ptr.vmem [resolvable:$false] %s597_s13 }
  0x1b   : > { %529 = vmatmul.mubr.msk.bf16.vlgmr.msra.gmra.mrb[0].mxu0 %vm325_vm1, %v301_v3  ;;  %v369_v6 = vld [vmem:[%s299_s30] sm:$0xff]  ;;  %s417_s20 = sshll.u32 %s285_s19, 4  ;;  %s797_s30 = scalar_lea.hbm %s851_s6, %s518_s18  ;;  %s799_s20 = int_to_ptr.vmem [resolvable:$true] %s417_s20 }
  0x1c   : > { %s593_s11 = scalar_lea.vmem %s799_s20, 128  ;;  %s599_s14 = scalar_lea.vmem %s598_s13, 256 }
  0x1d   : > { %p594_p12 = scmp.ne.s32.totalorder %s799_s20, %s593_s11  ;;  %p600_p1 = scmp.lt.s32.totalorder %s799_s20, %s598_s13 }
  0x1e   : > { %p601_p2 = scmp.lt.s32.totalorder %s599_s14, %s593_s11 }
  0x1f   : > { %p595_p13 = pnand %p594_p12, %p751_p4 }
  0x20   : > { %p602_p3 = por %p601_p2, %p600_p1 }
  0x21   : > { %p596_p0 = pneg %p595_p13 }
  0x23   : > { %p603_p5 = pnand %p602_p3, %p596_p0 }
  0xee   : > { %v363_v5 = vpop.f32.mrb[0].mxu0 }
  0xef   : > { %v364_v7 = vadd.f32 %v511_v4, %v363_v5  ;;  %v530_v8 = vpop.f32.mrb[1].mxu0 }
  0xf0   : > { %v366_v9 = vpop.f32.mrb[2].mxu0 }
  0xf1   : > { %v531_v10 = vpop.f32.mrb[3].mxu0  ;;  %v370_v11 = vadd.f32 %v369_v6, %v364_v7 }
  0xf3   : > { %v371_v12 = vsel %vm325_vm1, %v370_v11, 0.0 }
  0xf4   : > { %372 = vadd.xlane.f32.xlu0 %v371_v12 }
 0x181   : > { %v373_v13 = vpop.xlane.xlu0 %372 }
 0x182   : > { %v375_v14 = vmul.f32 0.03125, %v373_v13 }
 0x184   : > { %v376_v15 = vsub.f32 %v370_v11, %v375_v14 }
 0x186   : > { %v377_v16 = vmul.f32 %v376_v15, %v376_v15 }
 0x188   : > { %v378_v17 = vsel %vm325_vm1, %v377_v16, 0.0 }
 0x189   : > { %379 = vadd.xlane.f32.xlu0 %v378_v17 }
 0x216   : > { %v380_v18 = vpop.xlane.xlu0 %379 }
 0x217   : > { %v381_v19 = vmul.f32 0.03125, %v380_v18 }
 0x219   : > { %v382_v20 = vadd.f32 1e-05, %v381_v19 }
 0x21b   : > { %591 = vrsqrt.f32 %v382_v20 }
 0x225   : > { %v592_v21 = vpop.eup %591 }
 0x226   : > { %v384_v23 = vmul.f32 %v592_v21, %v376_v15 }
 0x228   : > { %v392_v25 = vmul.f32 %v515_v22, %v384_v23 }
 0x22a   : > { %v400_v26 = vadd.f32 %v516_v24, %v392_v25 }
 0x22c   : > { %401 = vst.msk [vmem:[%s285_s19] sm:$0xff] %vm325_vm1, %v400_v26 }
 0x22d   : > { %606 = shalt.err (!%p603_p5)
}
 0x22e   : > { %s607_s12 = scalar_lea.hbm %s797_s30, 128  ;;  %s611_s17 = scalar_lea.hbm %s851_s6, 256 }
 0x22f   : > { %p608_p6 = scmp.ne.s32.totalorder %s797_s30, %s607_s12  ;;  %p612_p10 = scmp.lt.u32.totalorder %s797_s30, %s851_s6 }
 0x230   : > { %p613_p11 = scmp.lt.u32.totalorder %s611_s17, %s607_s12  ;;  %p615_p13 = scmp.lt.u32.totalorder %s607_s12, %s797_s30 }
 0x231   : > { %p609_p7 = pnand %p608_p6, %p751_p4 }
 0x232   : > { %p614_p12 = por %p613_p11, %p612_p10 }
 0x233   : > { %p610_p9 = pneg %p609_p7 }
 0x234   : > { %p616_p0 = por %p615_p13, %p614_p12 }
 0x236   : > { %p617_p1 = pnand %p616_p0, %p610_p9 }
 0x238   : > { %620 = shalt.err (!%p617_p1)
}
 0x239   : > { %532 = dma.vmem_to_hbm [thread:$0]  (%p751_p4), %s799_s20, 128, %s797_s30, %s403_s8  }
 0x23a PF: > { %p538_p2 = scmp.ge.s32.totalorder %s671_s26, 2  ;;  %s429_s27 = sand.u32 1, %s651_s21  }
 0x23b   : > { %s430_s28 = scalar_lea.sflag [#allocation3], %s429_s27 }
 0x23c   : > { %p535_p3 = pnand %p538_p2, %p758_p8 }
 0x23e   : > { %646 = dma.done.wait (!%p535_p3), %s430_s28, 128  }
 0x23f   : > { %648 = vsyncadd (!%p535_p3), %s430_s28, 4294967168  ;;  %s19_s26 = sadd.s32 1, %s671_s26   ;;  %s854_s21 = smov %s655_s22 }
 0x240   : > { %p16_p5 = scmp.ge.s32.totalorder %s19_s26, 4   ;;  %s855_s22 = smov %s659_s23 }
 0x241   : > { %s856_s23 = smov %s764_s10  ;;  %s857_s24 = smov %s667_s25 }
 0x242   : > { %s858_s25 = smov %s860_s29  ;;  %18 = sbr.rel (!%p16_p5) target bundleno = 4 (0x4), region = 82 }
 0x249   :  { %435 = vsyncpa [#allocation3], 1 }
 0x24a   :  { %437 = vsyncpa [#allocation3 + $0x1], 1 }

// kernel: multi_head_attention.3
= control target key start
LH: loop header
LB: loop body
LE: loop exit
PB: predicated region body
PF: predicated region fallthrough
CT: control target
= control target key end

     0   :  { %s1078_s17 = smov 0   ;;  %s1080_s18 = smov 0   ;;  %s1167_s0 = inlined_call_operand.vmem [shape: bf16[2,8,32], index: 0, kind: input, shape index: {}]   ;;  %s1168_s1 = inlined_call_operand.vmem [shape: bf16[2,8,32], index: 1, kind: input, shape index: {}]   ;;  %s1169_s2 = inlined_call_operand.vmem [shape: bf16[2,8,32], index: 2, kind: input, shape index: {}]   ;;  %s1170_s3 = inlined_call_operand.vmem [shape: bf16[32,32], index: 3, kind: input, shape index: {}]   ;;  %s1171_s4 = inlined_call_operand.vmem [shape: bf16[32,32], index: 4, kind: input, shape index: {}]   ;;  %s1172_s5 = inlined_call_operand.vmem [shape: bf16[32,32], index: 5, kind: input, shape index: {}]   ;;  %s1173_s6 = inlined_call_operand.vmem [shape: f32[1,32], index: 6, kind: input, shape index: {}]   ;;  %s1174_s7 = inlined_call_operand.vmem [shape: f32[1,32], index: 7, kind: input, shape index: {}]   ;;  %s1175_s8 = inlined_call_operand.vmem [shape: f32[1,32], index: 8, kind: input, shape index: {}]   ;;  %s1176_s9 = inlined_call_operand.vmem [shape: bf16[2,8,32], index: 9, kind: output, shape index: {0}]   ;;  %s1177_s10 = inlined_call_operand.vmem [shape: bf16[2,8,32], index: 10, kind: output, shape index: {1}]   ;;  %s1178_s11 = inlined_call_operand.vmem [shape: bf16[2,8,32], index: 11, kind: output, shape index: {2}]  }
   0x1   :  { %s1082_s19 = smov 0  }
   0x2 LB: > { %s34_s20 = sadd.s32 1, %s1010_s18  ;;  %p906_p0 = scmp.ge.s32.totalorder %s1014_s19, 1  ;;  %s1014_s19 = sphi %s1082_s19, %s22_s19   ;;  %s1010_s18 = sphi %s1080_s18, %s1180_s18   ;;  %s1006_s17 = sphi %s1078_s17, %s1179_s17  }
   0x3   : > { %p36_p1 = scmp.ge.s32.totalorder %s34_s20, 2  ;;  %p392_p2 = scmp.lt.s32.totalorder %s1014_s19, 3 }
   0x5   : > { %s1182_s20 = smov (%p36_p1, %s34_s20), 0  ;;  %p393_p3 = pnand %p906_p0, %p392_p2 }
   0x6   : > { %v986_v0 = vld [vmem:[%s1170_s3] sm:$0xff] (!%p393_p3)   ;;  %v1016_v1 = vmov (!%p393_p3), 0.0   ;;  %v987_v2 = vld [vmem:[%s1170_s3 + $0x8] sm:$0xff] (!%p393_p3)   ;;  %vm1017_vm0 = vmmov (!%p393_p3), 0   ;;  %p464_p4 = scmp.lt.s32.totalorder (!%p393_p3), %s1006_s17, 1  ;;  %vm531_vm1 = vcmask (!%p393_p3), 261120  }
   0x7   : > { %396 = sbr.rel (%p393_p3) target bundleno = 243 (0xf3), region = 56  ;;  %936 = vmatprep.subr.bf16.mxu0 (!%p393_p3), %v1016_v1  ;;  %944 = vmatprep.subr.bf16.mxu1 (!%p393_p3), %v1016_v1  ;;  %v988_v3 = vld [vmem:[%s1171_s4] sm:$0xff] (!%p393_p3)   ;;  %v990_v4 = vld [vmem:[%s1171_s4 + $0x8] sm:$0xff] (!%p393_p3)   ;;  %vm576_vm2 = vcmask (!%p393_p3), 257024  }
   0x8   : > { %937 = vmatpush3.bf16.msra.mxu0 (!%p393_p3), %v986_v0  ;;  %940 = vmatprep.mubr.msk.bf16.mxu0 (!%p393_p3), %vm1017_vm0, %v1016_v1  ;;  %v989_v5 = vld [vmem:[%s1172_s5] sm:$0xff] (!%p393_p3)   ;;  %v991_v8 = vld [vmem:[%s1172_s5 + $0x8] sm:$0xff] (!%p393_p3)  }
   0x9   : > { %938 = vmatprep.subr.bf16.mxu0 (!%p393_p3), %v1016_v1  ;;  %948 = vmatprep.mubr.msk.bf16.mxu1 (!%p393_p3), %vm1017_vm0, %v1016_v1  ;;  %v913_v10 = vld [vmem:[%s1173_s6] ss:$0 sm:$0xff] (!%p393_p3) }
   0xa   : > { %945 = vmatpush3.bf16.msra.mxu1 (!%p393_p3), %v988_v3  ;;  %v917_v12 = vld [vmem:[%s1174_s7] ss:$0 sm:$0xff] (!%p393_p3) }
   0xb   : > { %946 = vmatprep.subr.bf16.mxu1 (!%p393_p3), %v1016_v1  ;;  %v921_v24 = vld [vmem:[%s1175_s8] ss:$0 sm:$0xff] (!%p393_p3) }
   0xc   : > { %939 = vmatpush3.bf16.msra.mxu0 (!%p393_p3), %v987_v2 }
   0xd   : > { %952 = vmatprep.subr.bf16.mxu0 (!%p393_p3), %v1016_v1 }
   0xe   : > { %s1184_s17 = smov (!%p464_p4, %s1006_s17), 1  ;;  %947 = vmatpush3.bf16.msra.mxu1 %v990_v4 }
   0xf   : > { %s1110_s29 = sshll.u32 %s1184_s17, 2 }
  0x10   : > { %s470_s15 = scalar_lea.vmem %s1167_s0, %s1110_s29  ;;  %s477_s22 = scalar_lea.vmem %s1168_s1, %s1110_s29 }
  0x11   : > { %v507_v6 = vld [vmem:[%s470_s15] sm:$0xf]  ;;  %s484_s26 = scalar_lea.vmem %s1169_s2, %s1110_s29  ;;  %s491_s15 = scalar_lea.vmem %s1176_s9, %s1110_s29 }
  0x12   : > { %v578_v7 = vld [vmem:[%s477_s22] sm:$0xf]  ;;  %941 = vmatmul.mubr.msk.bf16.vlgmr.msra.gmra.mrb[0].mxu0 %vm531_vm1, %v507_v6  ;;  %s498_s22 = scalar_lea.vmem %s1177_s10, %s1110_s29 }
  0x13   : > { %953 = vmatpush3.bf16.msra.mxu0 %v989_v5  ;;  %956 = vmatprep.mubr.msk.bf16.mxu0 %vm1017_vm0, %v1016_v1  ;;  %v647_v9 = vld [vmem:[%s484_s26] sm:$0xf]  ;;  %s505_s26 = scalar_lea.vmem %s1178_s11, %s1110_s29 }
  0x14   : > { %954 = vmatprep.subr.bf16.mxu0 %v1016_v1  ;;  %949 = vmatmul.mubr.msk.bf16.vlgmr.msra.gmra.mrb[0].mxu1 %vm531_vm1, %v578_v7 }
  0x17   : > { %955 = vmatpush3.bf16.msra.mxu0 %v991_v8 }
  0x1a   : > { %957 = vmatmul.mubr.msk.bf16.vlgmr.msra.gmra.mrb[4].mxu0 %vm531_vm1, %v647_v9 }
  0xe5   : > { %v569_v11 = vpop.f32.mrb[0].mxu0 }
  0xe6   : > { %v570_v13 = vadd.f32 %v913_v10, %v569_v11  ;;  %v942_v14 = vpop.f32.mrb[1].mxu0 }
  0xe7   : > { %v572_v15 = vpop.f32.mrb[2].mxu0  ;;  %v639_v16 = vpop.f32.mrb[0].mxu1 }
  0xe8   : > { %v575_v17 = vpack.c.bf16 %v570_v13, %v570_v13  ;;  %v943_v18 = vpop.f32.mrb[3].mxu0  ;;  %v640_v19 = vadd.f32 %v917_v12, %v639_v16  ;;  %v950_v20 = vpop.f32.mrb[1].mxu1 }
  0xe9   : > { %v642_v21 = vpop.f32.mrb[2].mxu1 }
  0xea   : > { %577 = vst.msk [vmem:[%s491_s15] sm:$0xf] %vm576_vm2, %v575_v17  ;;  %v645_v22 = vpack.c.bf16 %v640_v19, %v640_v19  ;;  %v951_v23 = vpop.f32.mrb[3].mxu1 }
  0xec   : > { %646 = vst.msk [vmem:[%s498_s22] sm:$0xf] %vm576_vm2, %v645_v22 }
  0xed   : > { %v708_v25 = vpop.f32.mrb[4].mxu0 }
  0xee   : > { %v709_v26 = vadd.f32 %v921_v24, %v708_v25  ;;  %v958_v27 = vpop.f32.mrb[5].mxu0 }
  0xef   : > { %v711_v28 = vpop.f32.mrb[6].mxu0 }
  0xf0   : > { %v714_v29 = vpack.c.bf16 %v709_v26, %v709_v26  ;;  %v959_v30 = vpop.f32.mrb[7].mxu0 }
  0xf2   : > { %715 = vst.msk [vmem:[%s505_s26] sm:$0xf] %vm576_vm2, %v714_v29 }
  0xf3 PF: > { %s22_s19 = sadd.s32 1, %s1014_s19   ;;  %s1179_s17 = smov %s1010_s18 }
  0xf4   : > { %p19_p5 = scmp.ge.s32.totalorder %s22_s19, 4   ;;  %s1180_s18 = smov %s1182_s20 }
  0xf6   :  { %21 = sbr.rel (!%p19_p5) target bundleno = 2 (0x2), region = 116 }

// kernel: multi_head_attention.4
= control target key start
LH: loop header
LB: loop body
LE: loop exit
PB: predicated region body
PF: predicated region fallthrough
CT: control target
= control target key end

     0   :  { %11 = vsyncpa [#allocation3], 0  ;;  %s1512_s0 = inlined_call_operand.vmem [shape: bf16[2,8,32], index: 0, kind: input, shape index: {}]   ;;  %s1513_s1 = inlined_call_operand.vmem [shape: bf16[2,8,32], index: 1, kind: input, shape index: {}]   ;;  %s1514_s2 = inlined_call_operand.vmem [shape: bf16[2,8,32], index: 2, kind: input, shape index: {}]   ;;  %s1515_s3 = inlined_call_operand.vmem [shape: s8[2,8,8], index: 3, kind: input, shape index: {}]   ;;  %s1516_s4 = inlined_call_operand.vmem [shape: bf16[2,8,32], index: 4, kind: output, shape index: {0}]   ;;  %s1517_s5 = inlined_call_operand.hbm [shape: bf16[2,4,8,8], index: 5, kind: output, shape index: {1}]  }
   0x1   :  { %13 = vsyncpa [#allocation3 + $0x1], 0  ;;  %s1286_s18 = smov 0   ;;  %s1288_s19 = smov 0  }
   0x2   :  { %s1290_s20 = smov 0   ;;  %s1292_s21 = smov 0  }
   0x3   :  { %s1294_s22 = smov 0   ;;  %s1296_s23 = smov 0  }
   0x4 LB: > { %s984_s24 = sadd.s32 4294967295, %s1242_s23   ;;  %s985_s25 = sadd.s32 4294967294, %s1242_s23   ;;  %s1242_s23 = sphi %s1296_s23, %s19_s23   ;;  %s1238_s22 = sphi %s1294_s22, %s1526_s22   ;;  %s1234_s21 = sphi %s1292_s21, %s1525_s21   ;;  %s1230_s20 = sphi %s1290_s20, %s1524_s20   ;;  %s1226_s19 = sphi %s1288_s19, %s1523_s19   ;;  %s1222_s18 = sphi %s1286_s18, %s1522_s18  }
   0x5   : > { %s31_s26 = sadd.s32 1, %s1238_s22  ;;  %s176_s27 = sadd.s32 1, %s1230_s20 }
   0x6   : > { %p33_p0 = scmp.ge.s32.totalorder %s31_s26, 2  ;;  %p186_p1 = scmp.ne.s32.totalorder %s1230_s20, %s1226_s19 }
   0x7   : > { %p187_p2 = scmp.eq.s32.totalorder %s984_s24, 1  ;;  %p192_p3 = scmp.ne.s32.totalorder %s1226_s19, %s1222_s18 }
   0x8   : > { %s1528_s26 = smov (%p33_p0, %s31_s26), 0  ;;  %p193_p5 = scmp.eq.s32.totalorder %s985_s25, 1 }
   0x9   : > { %p1326_p4 = por %p187_p2, %p186_p1  ;;  %s171_s29 = ssub.s32 %s1238_s22, %s1528_s26 }
   0xa   : > { %p988_p6 = scmp.ge.s32.totalorder %s1242_s23, 1  ;;  %p174_p7 = scmp.eq.s32.totalorder %s171_s29, 0 }
   0xb   : > { %p1333_p8 = por %p193_p5, %p192_p3  ;;  %p245_p9 = scmp.lt.s32.totalorder %s1242_s23, 3 }
   0xc   : > { %s1339_s6 = scalar_select %p174_p7, %s1230_s20, %s176_s27  }
   0xd   : > { %p246_p10 = pnand %p988_p6, %p245_p9 }
   0xe   : > { %p297_p11 = scmp.lt.s32.totalorder (!%p246_p10), %s1234_s21, 1  ;;  %v1244_v0 = vmov (!%p246_p10), 0.0   ;;  %vm1245_vm0 = vmmov (!%p246_p10), 0   ;;  %vm334_vm1 = vcmask (!%p246_p10), 64512   ;;  %v1246_v5 = vmov (!%p246_p10), 0   ;;  %s1247_s25 = smov (!%p246_p10), 120  }
   0xf   : > { %249 = sbr.rel (%p246_p10) target bundleno = 1485 (0x5cd), region = 36  ;;  %1031 = vmatprep.subr.bf16.mxu0 (!%p246_p10), %v1244_v0  ;;  %1033 = vmatprep.mubr.msk.bf16.mxu0 (!%p246_p10), %vm1245_vm0, %v1244_v0  ;;  %s1248_s27 = smov (!%p246_p10), 112   ;;  %vm402_vm4 = vcmask (!%p246_p10), 1043456   ;;  %vm397_vm5 = vcmask (!%p246_p10), 60416  }
  0x10   : > { %1037 = vmatprep.subr.bf16.mxu1 (!%p246_p10), %v1244_v0  ;;  %1039 = vmatprep.mubr.msk.bf16.mxu1 (!%p246_p10), %vm1245_vm0, %v1244_v0  ;;  %s1249_s29 = smov (!%p246_p10), 104   ;;  %s1014_s16 = sshll.u32 (!%p246_p10), %s1234_s21, 8 }
  0x16   : > { %s298_s7 = scalar_select %p297_p11, %s1234_s21, 1 }
  0x17   : > { %s1252_s21 = smov [#allocation2]  }
  0x18   : > { %s1349_s8 = sshll.u32 %s298_s7, 2  ;;  %s993_s15 = sshll.u32 %s298_s7, 1 }
  0x19   : > { %s307_s11 = scalar_lea.vmem %s1513_s1, %s1349_s8  ;;  %s303_s14 = scalar_lea.vmem %s1512_s0, %s1349_s8 }
  0x1a   : > { %v330_v1 = vld [vmem:[%s307_s11] sm:$0xf]  ;;  %s318_s24 = scalar_lea.vmem %s1515_s3, %s993_s15  ;;  %s311_s10 = scalar_lea.vmem %s1514_s2, %s1349_s8 }
  0x1b   : > { %v339_v2 = vsel %vm334_vm1, %v330_v1, 0  ;;  %v329_v3 = vld [vmem:[%s303_s14] sm:$0xf]  ;;  %v998_v15 = vcombine.low %v330_v1, %v330_v1  ;;  %s294_s11 = sand.u32 1, %s1226_s19   ;;  %s1250_s14 = smov 8  }
  0x1c   : > { %1032 = vmatpush3.bf16.xpose.msra.mxu0 %v339_v2  ;;  %v332_v4 = vld [vmem:[%s318_s24] sm:$0x3]  ;;  %v997_v16 = vcombine.low %v329_v3, %v329_v3  ;;  %s989_s12 = sshll.u32 %s294_s11, 4  ;;  %s1251_s15 = smov 16  }
  0x1d   : > { %1049 = vmatprep.subr.bf16.mxu0 %v1244_v0  ;;  %vm333_vm2 = vnez %v332_v4  ;;  %454 = vrot.lane.b32.xlu1 %v998_v15, %s1247_s25  ;;  %v1384_v22 = vld [vmem:[%s311_s10] sm:$0xf]  ;;  %s1394_s13 = scalar_lea.vmem [#allocation2], %s989_s12  ;;  %s1168_s9 = sshll.u32 %s1252_s21, 4  ;;  %s1169_s9 = int_to_ptr.vmem [resolvable:$false] %s1168_s9 }
  0x1e   : > { %v381_v6 = vsel %vm333_vm2, 16843009, %v1246_v5  ;;  %v404_v23 = vsel %vm402_vm4, %v1384_v22, 0  ;;  %s839_s17 = sshll.u32 %s1394_s13, 4  ;;  %s1170_s10 = scalar_lea.vmem %s1169_s9, 512  ;;  %s1456_s17 = int_to_ptr.vmem [resolvable:$true] %s839_s17 }
  0x1f   : > { %v382_v7 = vunpack.c.0.s8 %v381_v6  ;;  %1038 = vmatpush3.bf16.msra.mxu1 %v404_v23  ;;  %v1001_v6 = vcombine.low %v1384_v22, %v1384_v22  ;;  %s1164_s7 = scalar_lea.vmem %s1456_s17, 256  ;;  %p1171_p1 = scmp.lt.s32.totalorder %s1456_s17, %s1169_s9 }
  0x20   : > { %1043 = vmatprep.subr.bf16.mxu1 %v1244_v0  ;;  %p1165_p12 = scmp.ne.s32.totalorder %s1456_s17, %s1164_s7  ;;  %p1172_p2 = scmp.lt.s32.totalorder %s1170_s10, %s1164_s7 }
  0x21   : > { %vm1367_vm3 = vcmp.ne.s32.totalorder %v382_v7, 0  ;;  %449 = vrot.lane.b32.xlu1 %v997_v16, %s1247_s25 }
  0x22   : > { %p1166_p13 = pnand %p1165_p12, %p1326_p4  ;;  %p1173_p3 = por %p1172_p2, %p1171_p1 }
  0x23   : > { %1034 = vmatmul.mubr.msk.bf16.vlgmr.msra.gmra.mrb[0].mxu0 %vm334_vm1, %v329_v3 }
  0x24   : > { %1051 = vmatprep.mubr.msk.bf16.mxu0 %vm1245_vm0, %v1244_v0  ;;  %p1167_p0 = pneg %p1166_p13 }
  0x25   : > { %568 = vrot.lane.b32.xlu1 %v997_v16, %s1248_s27 }
  0x26   : > { %p1174_p5 = pnand %p1173_p3, %p1167_p0 }
  0x29   : > { %683 = vrot.lane.b32.xlu1 %v998_v15, %s1249_s29 }
  0x2d   : > { %681 = vrot.lane.b32.xlu1 %v997_v16, %s1249_s29 }
  0x8f   : > { %v455_v26 = vpop.permute.xlu1 %454 }
  0x90   : > { %v460_v28 = vsel %vm334_vm1, %v455_v26, 0 }
  0x93   : > { %v450_v30 = vpop.permute.xlu1 %449 }
  0x97   : > { %v569_v32 = vpop.permute.xlu1 %568 }
  0x9b   : > { %v684_v34 = vpop.permute.xlu1 %683 }
  0x9c   : > { %v689_v35 = vsel %vm334_vm1, %v684_v34, 0 }
  0x9f   : > { %v682_v36 = vpop.permute.xlu1 %681 }
  0xf6   : > { %v375_v9 = vpop.f32.mrb[0].mxu0 }
  0xf7   : > { %v384_v10 = vsel %vm1367_vm3, -1e+09, %v375_v9  ;;  %v1035_v11 = vpop.f32.mrb[1].mxu0 }
  0xf8   : > { %v378_v12 = vpop.f32.mrb[2].mxu0  ;;  %v385_v13 = vsel %vm334_vm1, %v384_v10, -inf }
  0xf9   : > { %386 = vmax.xlane.f32.xlu0 %v385_v13  ;;  %v1036_v14 = vpop.f32.mrb[3].mxu0 }
 0x186   : > { %v387_v17 = vpop.xlane.xlu0 %386 }
 0x187   : > { %v388_v18 = vsub.f32 %v384_v10, %v387_v17 }
 0x189   : > { %v389_v19 = vmul.f32 1.442695, %v388_v18 }
 0x18b   : > { %1148 = vpow2.f32 %v389_v19 }
 0x195   : > { %v1149_v20 = vpop.eup %1148 }
 0x196   : > { %v391_v21 = vsel %vm334_vm1, %v1149_v20, 0.0 }
 0x197   : > { %392 = vadd.xlane.f32.xlu0 %v391_v21 }
 0x1ad   : > { %570 = vrot.lane.b32.xlu0 %v998_v15, %s1248_s27 }
 0x224   : > { %v393_v24 = vpop.xlane.xlu0 %392 }
 0x225   : > { %1150 = vrcp.f32 %v393_v24 }
 0x228   : > { %v571_v31 = vpop.permute.xlu0 %570 }
 0x229   : > { %v576_v33 = vsel %vm334_vm1, %v571_v31, 0 }
 0x22f   : > { %v1151_v25 = vpop.eup %1150 }
 0x230   : > { %v395_v27 = vmul.f32 %v1151_v25, %v1149_v20 }
 0x232   : > { %v396_v29 = vpack.c.bf16 %v395_v27, %v395_v27 }
 0x234   : > { %398 = vst.msk [vmem:[%s1394_s13] sm:$0xf] %vm397_vm5, %v396_v29  ;;  %1040 = vmatmul.mubr.msk.bf16.vlgmr.msra.gmra.mrb[0].mxu1 %vm334_vm1, %v396_v29 }
 0x235   : > { %1044 = vmatpush3.bf16.xpose.msra.mxu1 %v460_v28  ;;  %1045 = vmatprep.mubr.msk.bf16.mxu1 %vm1245_vm0, %v1244_v0 }
 0x236   : > { %1055 = vmatprep.subr.bf16.mxu1 %v1244_v0 }
 0x23c   : > { %1046 = vmatmul.mubr.msk.bf16.vlgmr.msra.gmra.mrb[4].mxu1 %vm334_vm1, %v450_v30 }
 0x23d   : > { %1056 = vmatpush3.bf16.xpose.msra.mxu1 %v576_v33  ;;  %1057 = vmatprep.mubr.msk.bf16.mxu1 %vm1245_vm0, %v1244_v0 }
 0x23e   : > { %1067 = vmatprep.subr.bf16.mxu1 %v1244_v0 }
 0x244   : > { %1058 = vmatmul.mubr.msk.bf16.vlgmr.msra.gmra.mrb[8].mxu1 %vm334_vm1, %v569_v32 }
 0x245   : > { %1068 = vmatpush3.bf16.xpose.msra.mxu1 %v689_v35  ;;  %1069 = vmatprep.mubr.msk.bf16.mxu1 %vm1245_vm0, %v1244_v0 }
 0x24c   : > { %1070 = vmatmul.mubr.msk.bf16.vlgmr.msra.gmra.mrb[12].mxu1 %vm334_vm1, %v682_v36 }
 0x307   : > { %v1412_v37 = vpop.f32.mrb[0].mxu1 }
 0x308   : > { %v1041_v38 = vpop.f32.mrb[1].mxu1 }
 0x309   : > { %v443_v39 = vpop.f32.mrb[2].mxu1 }
 0x30a   : > { %v1042_v40 = vpop.f32.mrb[3].mxu1 }
 0x30f   : > { %v496_v41 = vpop.f32.mrb[4].mxu1 }
 0x310   : > { %v502_v42 = vsel %vm1367_vm3, -1e+09, %v496_v41  ;;  %v1047_v43 = vpop.f32.mrb[5].mxu1 }
 0x311   : > { %v499_v44 = vpop.f32.mrb[6].mxu1  ;;  %v503_v45 = vsel %vm334_vm1, %v502_v42, -inf }
 0x312   : > { %504 = vmax.xlane.f32.xlu1 %v503_v45  ;;  %v1048_v46 = vpop.f32.mrb[7].mxu1 }
 0x317   : > { %v612_v47 = vpop.f32.mrb[8].mxu1 }
 0x318   : > { %v618_v48 = vsel %vm1367_vm3, -1e+09, %v612_v47  ;;  %v1059_v49 = vpop.f32.mrb[9].mxu1 }
 0x319   : > { %v619_v50 = vsel %vm334_vm1, %v618_v48, -inf  ;;  %v615_v51 = vpop.f32.mrb[10].mxu1 }
 0x31a   : > { %620 = vmax.xlane.f32.xlu0 %v619_v50  ;;  %v1060_v52 = vpop.f32.mrb[11].mxu1 }
 0x31f   : > { %v725_v53 = vpop.f32.mrb[12].mxu1 }
 0x320   : > { %v731_v54 = vsel %vm1367_vm3, -1e+09, %v725_v53  ;;  %v1071_v55 = vpop.f32.mrb[13].mxu1 }
 0x321   : > { %v732_v56 = vsel %vm334_vm1, %v731_v54, -inf  ;;  %v728_v57 = vpop.f32.mrb[14].mxu1 }
 0x322   : > { %733 = vmax.xlane.f32.xlu1 %v732_v56  ;;  %v1072_v58 = vpop.f32.mrb[15].mxu1 }
 0x39f   : > { %v505_v59 = vpop.xlane.xlu1 %504 }
 0x3a0   : > { %v506_v60 = vsub.f32 %v502_v42, %v505_v59 }
 0x3a2   : > { %v507_v61 = vmul.f32 1.442695, %v506_v60 }
 0x3a4   : > { %1152 = vpow2.f32 %v507_v61 }
 0x3a7   : > { %v621_v62 = vpop.xlane.xlu0 %620 }
 0x3a8   : > { %v622_v63 = vsub.f32 %v618_v48, %v621_v62 }
 0x3aa   : > { %v623_v1 = vmul.f32 1.442695, %v622_v63 }
 0x3ac   : > { %1154 = vpow2.f32 %v623_v1 }
 0x3ae   : > { %v1153_v2 = vpop.eup %1152 }
 0x3af   : > { %v509_v3 = vsel %vm334_vm1, %v1153_v2, 0.0  ;;  %v734_v7 = vpop.xlane.xlu1 %733 }
 0x3b0   : > { %510 = vadd.xlane.f32.xlu1 %v509_v3  ;;  %v735_v8 = vsub.f32 %v731_v54, %v734_v7 }
 0x3b2   : > { %v736_v9 = vmul.f32 1.442695, %v735_v8 }
 0x3b4   : > { %1156 = vpow2.f32 %v736_v9 }
 0x3b6   : > { %v1155_v4 = vpop.eup %1154 }
 0x3b7   : > { %v625_v5 = vsel %vm334_vm1, %v1155_v4, 0.0 }
 0x3b8   : > { %626 = vadd.xlane.f32.xlu0 %v625_v5 }
 0x3be   : > { %v1157_v10 = vpop.eup %1156 }
 0x3bf   : > { %v738_v11 = vsel %vm334_vm1, %v1157_v10, 0.0 }
 0x3c1   : > { %633 = vrot.lane.b32.xlu1 %v1001_v6, %s1248_s27  ;;  %s1454_s27 = scalar_lea.hbm %s1517_s5, %s1014_s16 }
 0x3ce   : > { %520 = vrot.lane.b32.xlu0 %v1001_v6, %s1247_s25 }
 0x3e5   : > { %739 = vadd.xlane.f32.xlu1 %v738_v11 }
 0x3f6   : > { %746 = vrot.lane.b32.xlu1 %v1001_v6, %s1249_s29  ;;  %s1460_s29 = scalar_lea.sflag [#allocation3], %s294_s11 }
 0x43d   : > { %v511_v12 = vpop.xlane.xlu1 %510 }
 0x43e   : > { %1158 = vrcp.f32 %v511_v12 }
 0x441   : > { %v634_v18 = vpop.permute.xlu1 %633 }
 0x442   : > { %v639_v20 = vsel %vm402_vm4, %v634_v18, 0 }
 0x445   : > { %v627_v13 = vpop.xlane.xlu0 %626 }
 0x446   : > { %1160 = vrcp.f32 %v627_v13 }
 0x448   : > { %v1159_v14 = vpop.eup %1158 }
 0x449   : > { %v513_v15 = vmul.f32 %v1159_v14, %v1153_v2  ;;  %v521_v16 = vpop.permute.xlu0 %520 }
 0x44a   : > { %v526_v17 = vsel %vm402_vm4, %v521_v16, 0 }
 0x44b   : > { %1050 = vmatpush3.bf16.msra.mxu0 %v526_v17  ;;  %v514_v19 = vpack.c.bf16 %v513_v15, %v513_v15 }
 0x44c   : > { %1061 = vmatprep.subr.bf16.mxu0 %v1244_v0 }
 0x44d   : > { %1000 = vst.msk [vmem:[%s1394_s13 + $0x4] sm:$0xf] %vm397_vm5, %v514_v19 }
 0x44e   : > { %1052 = vmatmul.mubr.msk.bf16.vlgmr.msra.gmra.mrb[4].mxu0 %vm334_vm1, %v514_v19 }
 0x44f   : > { %1062 = vmatpush3.bf16.msra.mxu0 %v639_v20  ;;  %1063 = vmatprep.mubr.msk.bf16.mxu0 %vm1245_vm0, %v1244_v0 }
 0x450   : > { %v1161_v21 = vpop.eup %1160  ;;  %1073 = vmatprep.subr.bf16.mxu0 %v1244_v0 }
 0x451   : > { %v629_v22 = vmul.f32 %v1161_v21, %v1155_v4 }
 0x453   : > { %v630_v23 = vpack.c.bf16 %v629_v22, %v629_v22 }
 0x455   : > { %1004 = vst.msk [vmem:[%s1394_s13 + $0x8] sm:$0xf] %vm397_vm5, %v630_v23 }
 0x456   : > { %1064 = vmatmul.mubr.msk.bf16.vlgmr.msra.gmra.mrb[8].mxu0 %vm334_vm1, %v630_v23 }
 0x457   : > { %1075 = vmatprep.mubr.msk.bf16.mxu0 %vm1245_vm0, %v1244_v0 }
 0x472   : > { %v740_v24 = vpop.xlane.xlu1 %739 }
 0x473   : > { %1162 = vrcp.f32 %v740_v24 }
 0x476   : > { %v747_v25 = vpop.permute.xlu1 %746 }
 0x477   : > { %v752_v26 = vsel %vm402_vm4, %v747_v25, 0 }
 0x478   : > { %1074 = vmatpush3.bf16.msra.mxu0 %v752_v26 }
 0x47d   : > { %v1163_v27 = vpop.eup %1162 }
 0x47e   : > { %v742_v28 = vmul.f32 %v1163_v27, %v1157_v10 }
 0x480   : > { %v743_v29 = vpack.c.bf16 %v742_v28, %v742_v28 }
 0x482   : > { %1007 = vst.msk [vmem:[%s1394_s13 + $0xc] sm:$0xf] %vm397_vm5, %v743_v29  ;;  %1076 = vmatmul.mubr.msk.bf16.vlgmr.msra.gmra.mrb[12].mxu0 %vm334_vm1, %v743_v29 }
 0x521   : > { %v562_v30 = vpop.f32.mrb[4].mxu0 }
 0x522   : > { %795 = vrot.lane.b32.xlu0 %v562_v30, %s1250_s14  ;;  %v1053_v0 = vpop.f32.mrb[5].mxu0 }
 0x523   : > { %v565_v31 = vpop.f32.mrb[6].mxu0 }
 0x524   : > { %v1054_v32 = vpop.f32.mrb[7].mxu0 }
 0x529   : > { %v675_v33 = vpop.f32.mrb[8].mxu0 }
 0x52a   : > { %799 = vrot.lane.b32.xlu1 %v675_v33, %s1251_s15  ;;  %v1065_v34 = vpop.f32.mrb[9].mxu0 }
 0x52b   : > { %v678_v35 = vpop.f32.mrb[10].mxu0 }
 0x52c   : > { %v1066_v36 = vpop.f32.mrb[11].mxu0 }
 0x52d   : > { %1177 = shalt.err (!%p1174_p5)
}
 0x52e   : > { %s1178_s11 = scalar_lea.hbm %s1454_s27, 256  ;;  %s1182_s14 = scalar_lea.hbm %s1517_s5, 512 }
 0x52f   : > { %p1179_p6 = scmp.ne.s32.totalorder %s1454_s27, %s1178_s11  ;;  %p1183_p10 = scmp.lt.u32.totalorder %s1454_s27, %s1517_s5 }
 0x530   : > { %p1184_p11 = scmp.lt.u32.totalorder %s1182_s14, %s1178_s11  ;;  %p1186_p13 = scmp.lt.u32.totalorder %s1178_s11, %s1454_s27 }
 0x531   : > { %p1180_p7 = pnand %p1179_p6, %p1326_p4 }
 0x532   : > { %p1185_p12 = por %p1184_p11, %p1183_p10 }
 0x533   : > { %p1181_p9 = pneg %p1180_p7 }
 0x534   : > { %p1187_p0 = por %p1186_p13, %p1185_p12 }
 0x536   : > { %p1188_p1 = pnand %p1187_p0, %p1181_p9 }
 0x538   : > { %1191 = shalt.err (!%p1188_p1)
}
 0x539   : > { %s1253_s24 = smov 64   ;;  %s1254_s25 = smov 4   ;;  %vm807_vm6 = vcmask 130048   ;;  %vm809_vm7 = vcmask 195584   ;;  %vm812_vm8 = vcmask 257024  }
 0x53a   : > { %1079 = dma.vmem_to_hbm [thread:$0]  (%p1326_p4), %s1456_s17, 256, %s1454_s27, %s1460_s29, %s1253_s24, %s1253_s24, %s1254_s25  }
 0x53b   : > { %s1255_s7 = smov 24   ;;  %s325_s28 = scalar_lea.vmem %s1516_s4, %s1349_s8 }
 0x555   : > { %v788_v38 = vpop.f32.mrb[12].mxu0 }
 0x556   : > { %803 = vrot.lane.b32.xlu0 %v788_v38, %s1255_s7  ;;  %v1077_v39 = vpop.f32.mrb[13].mxu0 }
 0x557   : > { %v791_v40 = vpop.f32.mrb[14].mxu0 }
 0x558   : > { %v1078_v41 = vpop.f32.mrb[15].mxu0 }
 0x594   : > { %v796_v42 = vpop.permute.xlu0 %795 }
 0x595   : > { %v806_v44 = vsel %vm334_vm1, %v1412_v37, %v796_v42 }
 0x59c   : > { %v800_v43 = vpop.permute.xlu1 %799 }
 0x59d   : > { %v808_v45 = vsel %vm807_vm6, %v806_v44, %v800_v43 }
 0x5c8   : > { %v804_v46 = vpop.permute.xlu0 %803 }
 0x5c9   : > { %v810_v47 = vsel %vm809_vm7, %v808_v45, %v804_v46 }
 0x5ca   : > { %v811_v48 = vpack.c.bf16 %v810_v47, %v810_v47 }
 0x5cc   : > { %813 = vst.msk [vmem:[%s325_s28] sm:$0xf] %vm812_vm8, %v811_v48 }
 0x5cd PF: > { %p1085_p4 = scmp.ge.s32.totalorder %s1242_s23, 2  ;;  %s864_s17 = sand.u32 1, %s1222_s18  }
 0x5ce   : > { %s865_s27 = scalar_lea.sflag [#allocation3], %s864_s17 }
 0x5cf   : > { %p1082_p2 = pnand %p1085_p4, %p1333_p8 }
 0x5d1   : > { %1217 = dma.done.wait (!%p1082_p2), %s865_s27, 256  }
 0x5d2   : > { %1219 = vsyncadd (!%p1082_p2), %s865_s27, 4294967040  ;;  %s19_s23 = sadd.s32 1, %s1242_s23   ;;  %s1522_s18 = smov %s1226_s19 }
 0x5d3   : > { %p16_p3 = scmp.ge.s32.totalorder %s19_s23, 4   ;;  %s1523_s19 = smov %s1230_s20 }
 0x5d4   : > { %s1524_s20 = smov %s1339_s6  ;;  %s1525_s21 = smov %s1238_s22 }
 0x5d5   : > { %s1526_s22 = smov %s1528_s26  ;;  %18 = sbr.rel (!%p16_p3) target bundleno = 4 (0x4), region = 95 }
 0x5dc   :  { %870 = vsyncpa [#allocation3], 1 }
 0x5dd   :  { %872 = vsyncpa [#allocation3 + $0x1], 1 }

</bundles_post_ra>
